<compile_context>
chip_gen: v7x
topology: tpu7x:2x2x1
jax: 0.10.0
libtpu: 0.0.40
codegen_flags: <defaults>
</compile_context>

<pallas_src>
import jax
import jax.numpy as jnp
from jax.experimental import pallas as pl
from jax.experimental.pallas import tpu as pltpu

# ----------------------- small synthetic ViT config -------------------------
PATCH = 16
IMG = 32                   # 32x32 image -> 2x2 = 4 patches
IN_CH = 3
EMBED_DIM = 64             # real EndoViT: 768
DEPTH = 2                  # real EndoViT: 12
NUM_HEADS = 4              # real EndoViT: 12
MLP_RATIO = 4
HEAD_DIM = EMBED_DIM // NUM_HEADS
HIDDEN = EMBED_DIM * MLP_RATIO
LN_EPS = 1e-6
L2_EPS = 1e-12             # F.normalize default eps
NUM_PATCHES = (IMG // PATCH) * (IMG // PATCH)
SEQ_LEN = NUM_PATCHES + 1
PATCH_FEATS = IN_CH * PATCH * PATCH
N_VEC_ROWS = 9             # ln1_g, ln1_b, bq, bk, bv, proj_b, ln2_g, ln2_b, fc2_b

_F32 = jnp.float32
_BF16 = jnp.bfloat16


# ------------------------------ in-kernel math -------------------------------
def _ln_f32(x, g, b, eps=LN_EPS):
    """LayerNorm over the last dim; statistics in f32."""
    mean = jnp.mean(x, axis=-1, keepdims=True)
    var = jnp.mean((x - mean) ** 2, axis=-1, keepdims=True)
    return (x - mean) * jax.lax.rsqrt(var + eps) * g + b


def _gelu_erf(x):
    """Exact (erf) GELU, matching nn.GELU, in f32."""
    return 0.5 * x * (1.0 + jax.lax.erf(x * (1.0 / jnp.sqrt(jnp.float32(2.0)))))


# --------------------------------- kernel ------------------------------------
def _fused_vit_kernel(patches_ref, patch_w_ref, add_ref, w4_ref, vecs_ref,
                      fc1_w_ref, fc1_b_ref, fc2_w_ref, lnf_ref, o_ref):
    """Whole ViT forward for one batch element: patch-embed -> DEPTH blocks
    -> final LN on CLS -> L2 normalize. Residual stream stays in f32."""
    # ---- patch embedding: one matmul + one add builds the full (T, D) tile.
    # Row 0 of `patches` is all zeros, so the CLS row comes entirely from
    # add_ref[0] (= cls_token + pos[0]); the conv bias is folded into rows 1..
    x = jnp.dot(patches_ref[...], patch_w_ref[...],
                preferred_element_type=jnp.float32) + add_ref[...]     # (T, D) f32

    lane = jax.lax.broadcasted_iota(jnp.int32, (1, EMBED_DIM), 1)

    for d in range(DEPTH):                                  # static unroll
        def vrow(i, _d=d):
            return vecs_ref[_d, pl.ds(i, 1), :]             # (1, D) f32
        ln1_g, ln1_b = vrow(0), vrow(1)
        bq, bk, bv = vrow(2), vrow(3), vrow(4)
        proj_b, ln2_g, ln2_b, fc2_b = vrow(5), vrow(6), vrow(7), vrow(8)

        # ---- attention branch: LN1 -> Q/K/V -> per-head softmax attn -> proj
        h = _ln_f32(x, ln1_g, ln1_b)
        hb = h.astype(_BF16)
        # 1/sqrt(head_dim) is pre-folded into wq / bq at init time.
        q = jnp.dot(hb, w4_ref[d, 0, :, :], preferred_element_type=jnp.float32) + bq
        k = jnp.dot(hb, w4_ref[d, 1, :, :], preferred_element_type=jnp.float32) + bk
        v = jnp.dot(hb, w4_ref[d, 2, :, :], preferred_element_type=jnp.float32) + bv

        # Per-head attention via a block-diagonal feature mask: masking k
        # zeroes the other heads' contributions to the scores (exact), and
        # masking v makes each head's output land in its own columns, so the
        # head sum reproduces the concatenated multi-head output with no
        # lane-offset slicing / reshape / transpose inside the kernel.
        qb = q.astype(_BF16)
        attn = jnp.zeros_like(q)
        for hh in range(NUM_HEADS):
            m = (lane >= hh * HEAD_DIM) & (lane < (hh + 1) * HEAD_DIM)
            kh = jnp.where(m, k, 0.0).astype(_BF16)
            vh = jnp.where(m, v, 0.0).astype(_BF16)
            s = jax.lax.dot_general(qb, kh, (((1,), (1,)), ((), ())),
                                    preferred_element_type=jnp.float32)  # (T, T)
            s = s - jnp.max(s, axis=-1, keepdims=True)
            p = jnp.exp(s)
            p = p / jnp.sum(p, axis=-1, keepdims=True)       # exact (parity w/ torch)
            attn = attn + jnp.dot(p.astype(_BF16), vh,
                                  preferred_element_type=jnp.float32)

        # proj with bias + residual fused into the matmul epilogue
        x = jnp.dot(attn.astype(_BF16), w4_ref[d, 3, :, :],
                    preferred_element_type=jnp.float32) + proj_b + x

        # ---- MLP branch: LN2 -> fc1 -> GELU -> fc2 (+bias +residual)
        h = _ln_f32(x, ln2_g, ln2_b)
        h = jnp.dot(h.astype(_BF16), fc1_w_ref[d, :, :],
                    preferred_element_type=jnp.float32) + fc1_b_ref[d, :, :]
        h = _gelu_erf(h)
        x = jnp.dot(h.astype(_BF16), fc2_w_ref[d, :, :],
                    preferred_element_type=jnp.float32) + fc2_b + x

    # ---- final LayerNorm on the CLS row + F.normalize(dim=-1) ----
    cls = x[0:1, :]
    y = _ln_f32(cls, lnf_ref[pl.ds(0, 1), :], lnf_ref[pl.ds(1, 1), :])
    nrm = jnp.sqrt(jnp.sum(y * y, axis=-1, keepdims=True))
    o_ref[...] = (y / jnp.maximum(nrm, L2_EPS)).astype(o_ref.dtype)


# ------------------------------ pallas wrapper --------------------------------
@jax.jit
def endovit_encoder_forward(images, packed):
    """images: NCHW float32 [B, 3, H, W]; returns L2-normalized CLS [B, D]."""
    # TODO(synk): dropout is identity here (the backbone runs in eval()).
    B, C, H, W = images.shape
    gh, gw = H // PATCH, W // PATCH
    n_patch = gh * gw
    T = n_patch + 1

    # im2col patch extraction (glue) — matches Conv2d(k=16, s=16) with the conv
    # weight flattened as weight.reshape(D, C*P*P).T.
    # TODO(synk): at real image sizes fold this into the kernel via index_map /
    # strided DMA instead of an XLA transpose of the whole image tensor.
    xi = images.astype(_BF16).reshape(B, C, gh, PATCH, gw, PATCH)
    patches = xi.transpose(0, 2, 4, 1, 3, 5).reshape(B, n_patch, PATCH_FEATS)
    # Zero leading row: the CLS token row is produced purely by the add-table
    # epilogue, so the kernel needs no concat / partial stores.
    patches = jnp.concatenate(
        [jnp.zeros((B, 1, PATCH_FEATS), _BF16), patches], axis=1)        # (B, T, F)

    out = pl.pallas_call(
        _fused_vit_kernel,
        out_shape=jax.ShapeDtypeStruct((B, 1, EMBED_DIM), _F32),
        grid=(B,),
        in_specs=[
            pl.BlockSpec((None, T, PATCH_FEATS), lambda b: (b, 0, 0)),
            pl.BlockSpec((PATCH_FEATS, EMBED_DIM), lambda b: (0, 0)),
            pl.BlockSpec((T, EMBED_DIM), lambda b: (0, 0)),
            pl.BlockSpec((DEPTH, 4, EMBED_DIM, EMBED_DIM), lambda b: (0, 0, 0, 0)),
            pl.BlockSpec((DEPTH, N_VEC_ROWS, EMBED_DIM), lambda b: (0, 0, 0)),
            pl.BlockSpec((DEPTH, EMBED_DIM, HIDDEN), lambda b: (0, 0, 0)),
            pl.BlockSpec((DEPTH, 1, HIDDEN), lambda b: (0, 0, 0)),
            pl.BlockSpec((DEPTH, HIDDEN, EMBED_DIM), lambda b: (0, 0, 0)),
            pl.BlockSpec((2, EMBED_DIM), lambda b: (0, 0)),
        ],
        out_specs=pl.BlockSpec((None, 1, EMBED_DIM), lambda b: (b, 0, 0)),
        # Batch as a "parallel" axis keeps both v7x TensorCores busy; on
        # v5e/v6e (1 TC) it is a 2-step serial loop (~0.7 us total overhead).
        # All weights (~0.3 MB) trivially fit VMEM, so no vmem_limit override.
        compiler_params=pltpu.CompilerParams(dimension_semantics=("parallel",)),
    )(patches, packed["patch_w"], packed["add_tab"], packed["w4"],
      packed["vecs"], packed["fc1_w"], packed["fc1_b"], packed["fc2_w"],
      packed["lnf"])
    return out.reshape(B, EMBED_DIM)


# ------------------------------- parameters ----------------------------------
def _winit(key, shape, scale=0.02):
    return scale * jax.random.normal(key, shape, dtype=_F32)


def init_raw_params(key):
    """Logical ViT parameters (weights bf16, biases/LN f32)."""
    D, Hd = EMBED_DIM, HIDDEN
    kk = jax.random.split(key, 4 + DEPTH)
    raw = dict(
        patch_w=_winit(kk[0], (PATCH_FEATS, D)).astype(_BF16),  # conv w flattened
        patch_b=_winit(kk[1], (D,)),
        cls=_winit(kk[2], (1, D)),
        pos=_winit(kk[3], (SEQ_LEN, D)),
        lnf_g=jnp.ones((D,), _F32),
        lnf_b=jnp.zeros((D,), _F32),
        blocks=[],
    )
    for i in range(DEPTH):
        kb = jax.random.split(kk[4 + i], 12)
        raw["blocks"].append(dict(
            ln1_g=jnp.ones((D,), _F32), ln1_b=jnp.zeros((D,), _F32),
            wq=_winit(kb[0], (D, D)).astype(_BF16), bq=_winit(kb[1], (D,)),
            wk=_winit(kb[2], (D, D)).astype(_BF16), bk=_winit(kb[3], (D,)),
            wv=_winit(kb[4], (D, D)).astype(_BF16), bv=_winit(kb[5], (D,)),
            proj_w=_winit(kb[6], (D, D)).astype(_BF16), proj_b=_winit(kb[7], (D,)),
            ln2_g=jnp.ones((D,), _F32), ln2_b=jnp.zeros((D,), _F32),
            fc1_w=_winit(kb[8], (D, Hd)).astype(_BF16), fc1_b=_winit(kb[9], (Hd,)),
            fc2_w=_winit(kb[10], (Hd, D)).astype(_BF16), fc2_b=_winit(kb[11], (D,)),
        ))
    return raw


def pack_params(raw):
    """Pack per-block params for the fused kernel: stack along DEPTH, merge the
    tiny per-block vectors into one array, fold 1/sqrt(Dh) into wq/bq, and fold
    cls/pos/conv-bias into a single embedding add-table."""
    scale = jnp.float32(1.0 / float(HEAD_DIM) ** 0.5)
    # row 0: cls + pos[0]   (patch row 0 is zero-padded);  rows 1..: patch_b + pos[1:]
    add_tab = jnp.concatenate(
        [raw["cls"] + raw["pos"][:1],
         raw["patch_b"][None, :] + raw["pos"][1:]], axis=0).astype(_F32)

    w4, vecs, fc1w, fc1b, fc2w = [], [], [], [], []
    for blk in raw["blocks"]:
        wq_scaled = (blk["wq"].astype(_F32) * scale).astype(_BF16)
        w4.append(jnp.stack([wq_scaled, blk["wk"], blk["wv"], blk["proj_w"]]))
        vecs.append(jnp.stack([
            blk["ln1_g"], blk["ln1_b"],
            blk["bq"] * scale, blk["bk"], blk["bv"],
            blk["proj_b"], blk["ln2_g"], blk["ln2_b"], blk["fc2_b"]]))
        fc1w.append(blk["fc1_w"])
        fc1b.append(blk["fc1_b"][None, :])
        fc2w.append(blk["fc2_w"])

    return dict(
        patch_w=raw["patch_w"],
        add_tab=add_tab,
        w4=jnp.stack(w4).astype(_BF16),                     # (DEPTH, 4, D, D)
        vecs=jnp.stack(vecs).astype(_F32),                  # (DEPTH, 9, D)
        fc1_w=jnp.stack(fc1w).astype(_BF16),                # (DEPTH, D, H)
        fc1_b=jnp.stack(fc1b).astype(_F32),                 # (DEPTH, 1, H)
        fc2_w=jnp.stack(fc2w).astype(_BF16),                # (DEPTH, H, D)
        lnf=jnp.stack([raw["lnf_g"], raw["lnf_b"]]).astype(_F32),  # (2, D)
    )


# --------------------------- pure-JAX reference --------------------------------
@jax.jit
def _reference_forward(images, raw):
    """f32 reference of the same (synthetic-weight) ViT forward, for parity."""
    B = images.shape[0]
    gh = gw = IMG // PATCH
    x = images.reshape(B, IN_CH, gh, PATCH, gw, PATCH)
    patches = x.transpose(0, 2, 4, 1, 3, 5).reshape(B, NUM_PATCHES, PATCH_FEATS)
    patches = patches.astype(_BF16).astype(jnp.float32)

    def ln(v, g, b):
        m = v.mean(-1, keepdims=True)
        var = ((v - m) ** 2).mean(-1, keepdims=True)
        return (v - m) * jax.lax.rsqrt(var + LN_EPS) * g + b

    emb = patches @ raw["patch_w"].astype(jnp.float32) + raw["patch_b"]
    cls = jnp.broadcast_to(raw["cls"], (B, 1, EMBED_DIM))
    t = jnp.concatenate([cls, emb], axis=1) + raw["pos"][None]

    scale = 1.0 / float(HEAD_DIM) ** 0.5
    for blk in raw["blocks"]:
        h = ln(t, blk["ln1_g"], blk["ln1_b"])
        q = (h @ blk["wq"].astype(jnp.float32) + blk["bq"]) * scale
        k = h @ blk["wk"].astype(jnp.float32) + blk["bk"]
        v = h @ blk["wv"].astype(jnp.float32) + blk["bv"]

        def split(a):
            return a.reshape(B, SEQ_LEN, NUM_HEADS, HEAD_DIM).transpose(0, 2, 1, 3)

        s = jnp.einsum("bhqd,bhkd->bhqk", split(q), split(k))
        p = jax.nn.softmax(s, axis=-1)
        o = jnp.einsum("bhqk,bhkd->bhqd", p, split(v))
        o = o.transpose(0, 2, 1, 3).reshape(B, SEQ_LEN, EMBED_DIM)
        t = t + (o @ blk["proj_w"].astype(jnp.float32) + blk["proj_b"])

        h = ln(t, blk["ln2_g"], blk["ln2_b"])
        h = h @ blk["fc1_w"].astype(jnp.float32) + blk["fc1_b"]
        h = 0.5 * h * (1.0 + jax.lax.erf(h / jnp.sqrt(jnp.float32(2.0))))
        t = t + (h @ blk["fc2_w"].astype(jnp.float32) + blk["fc2_b"])

    y = ln(t[:, 0], raw["lnf_g"], raw["lnf_b"])
    nrm = jnp.sqrt(jnp.sum(y * y, axis=-1, keepdims=True))
    return y / jnp.maximum(nrm, L2_EPS)


# ----------------------------------- main --------------------------------------
if __name__ == "__main__":
    key = jax.random.PRNGKey(0)
    k_img, k_par = jax.random.split(key)
    images = jax.random.normal(k_img, (2, IN_CH, IMG, IMG), dtype=_F32)  # NCHW

    raw = init_raw_params(k_par)
    packed = pack_params(raw)

    out = jax.block_until_ready(endovit_encoder_forward(images, packed))
    assert out.shape == (2, EMBED_DIM)
    # rows are unit-norm after F.normalize
    assert bool(jnp.all(jnp.abs(jnp.sum(out * out, axis=-1) - 1.0) < 1e-4))
    # parity with the pure-JAX f32 reference (bf16 activation rounding only)
    ref = jax.block_until_ready(_reference_forward(images, raw))
    max_diff = float(jnp.max(jnp.abs(out - ref)))
    assert max_diff < 5e-2, max_diff
    print("KERNEL_OK")
</pallas_src>

<mosaic_0001>
module attributes {stable_mosaic.version = 11 : i64} {
  func.func @_fused_vit_kernel(%arg0: i32, %arg1: memref<1x5x768xbf16, #tpu.memory_space<vmem>>, %arg2: memref<768x64xbf16, #tpu.memory_space<vmem>>, %arg3: memref<5x64xf32, #tpu.memory_space<vmem>>, %arg4: memref<2x4x64x64xbf16, #tpu.memory_space<vmem>>, %arg5: memref<2x9x64xf32, #tpu.memory_space<vmem>>, %arg6: memref<2x64x256xbf16, #tpu.memory_space<vmem>>, %arg7: memref<2x1x256xf32, #tpu.memory_space<vmem>>, %arg8: memref<2x256x64xbf16, #tpu.memory_space<vmem>>, %arg9: memref<2x64xf32, #tpu.memory_space<vmem>>, %arg10: memref<1x1x64xf32, #tpu.memory_space<vmem>>) attributes {dimension_semantics = [#tpu.dimension_semantics<parallel>], iteration_bounds = array<i64: 2>, scalar_prefetch = 0 : i64, scratch_operands = 0 : i64, tpu.core_type = #tpu.core_type<tc>, window_params = [{transform_indices = @transform_0, window_bounds = array<i64: 1, 5, 768>}, {pipeline_mode = #tpu.pipeline_mode<synchronous>, transform_indices = @transform_1, window_bounds = array<i64: 768, 64>}, {pipeline_mode = #tpu.pipeline_mode<synchronous>, transform_indices = @transform_2, window_bounds = array<i64: 5, 64>}, {pipeline_mode = #tpu.pipeline_mode<synchronous>, transform_indices = @transform_3, window_bounds = array<i64: 2, 4, 64, 64>}, {pipeline_mode = #tpu.pipeline_mode<synchronous>, transform_indices = @transform_4, window_bounds = array<i64: 2, 9, 64>}, {pipeline_mode = #tpu.pipeline_mode<synchronous>, transform_indices = @transform_5, window_bounds = array<i64: 2, 64, 256>}, {pipeline_mode = #tpu.pipeline_mode<synchronous>, transform_indices = @transform_6, window_bounds = array<i64: 2, 1, 256>}, {pipeline_mode = #tpu.pipeline_mode<synchronous>, transform_indices = @transform_7, window_bounds = array<i64: 2, 256, 64>}, {pipeline_mode = #tpu.pipeline_mode<synchronous>, transform_indices = @transform_8, window_bounds = array<i64: 2, 64>}, {transform_indices = @transform_9, window_bounds = array<i64: 1, 1, 64>}]} {
    %c0 = arith.constant 0 : index
    %c0_0 = arith.constant 0 : index
    %c0_1 = arith.constant 0 : index
    %0 = vector.load %arg1[%c0, %c0_0, %c0_1] : memref<1x5x768xbf16, #tpu.memory_space<vmem>>, vector<1x5x768xbf16>
    %1 = vector.shape_cast %0 : vector<1x5x768xbf16> to vector<5x768xbf16>
    %c0_2 = arith.constant 0 : index
    %c0_3 = arith.constant 0 : index
    %2 = vector.load %arg2[%c0_2, %c0_3] : memref<768x64xbf16, #tpu.memory_space<vmem>>, vector<768x64xbf16>
    %cst = arith.constant dense<0.000000e+00> : vector<5x64xf32>
    %3 = tpu.matmul %1, %2, %cst {dimension_numbers = #tpu.dot_dimension_numbers<[1], [0], [0], [1], [0, 0, 1, 1], [], []>} : vector<5x768xbf16>, vector<768x64xbf16>, vector<5x64xf32> -> vector<5x64xf32>
    %c0_4 = arith.constant 0 : index
    %c0_5 = arith.constant 0 : index
    %4 = vector.load %arg3[%c0_4, %c0_5] : memref<5x64xf32, #tpu.memory_space<vmem>>, vector<5x64xf32>
    %5 = arith.addf %3, %4 : vector<5x64xf32>
    %6 = tpu.iota {dimensions = array<i32: 1>} : vector<1x64xi32>
    %c0_6 = arith.constant 0 : index
    %c0_7 = arith.constant 0 : index
    %c0_8 = arith.constant 0 : index
    %7 = vector.load %arg5[%c0_6, %c0_7, %c0_8] : memref<2x9x64xf32, #tpu.memory_space<vmem>>, vector<1x1x64xf32>
    %8 = vector.shape_cast %7 : vector<1x1x64xf32> to vector<1x64xf32>
    %c0_9 = arith.constant 0 : index
    %c1 = arith.constant 1 : index
    %c0_10 = arith.constant 0 : index
    %9 = vector.load %arg5[%c0_9, %c1, %c0_10] : memref<2x9x64xf32, #tpu.memory_space<vmem>>, vector<1x1x64xf32>
    %10 = vector.shape_cast %9 : vector<1x1x64xf32> to vector<1x64xf32>
    %c0_11 = arith.constant 0 : index
    %c2 = arith.constant 2 : index
    %c0_12 = arith.constant 0 : index
    %11 = vector.load %arg5[%c0_11, %c2, %c0_12] : memref<2x9x64xf32, #tpu.memory_space<vmem>>, vector<1x1x64xf32>
    %12 = vector.shape_cast %11 : vector<1x1x64xf32> to vector<1x64xf32>
    %c0_13 = arith.constant 0 : index
    %c3 = arith.constant 3 : index
    %c0_14 = arith.constant 0 : index
    %13 = vector.load %arg5[%c0_13, %c3, %c0_14] : memref<2x9x64xf32, #tpu.memory_space<vmem>>, vector<1x1x64xf32>
    %14 = vector.shape_cast %13 : vector<1x1x64xf32> to vector<1x64xf32>
    %c0_15 = arith.constant 0 : index
    %c4 = arith.constant 4 : index
    %c0_16 = arith.constant 0 : index
    %15 = vector.load %arg5[%c0_15, %c4, %c0_16] : memref<2x9x64xf32, #tpu.memory_space<vmem>>, vector<1x1x64xf32>
    %16 = vector.shape_cast %15 : vector<1x1x64xf32> to vector<1x64xf32>
    %c0_17 = arith.constant 0 : index
    %c5 = arith.constant 5 : index
    %c0_18 = arith.constant 0 : index
    %17 = vector.load %arg5[%c0_17, %c5, %c0_18] : memref<2x9x64xf32, #tpu.memory_space<vmem>>, vector<1x1x64xf32>
    %18 = vector.shape_cast %17 : vector<1x1x64xf32> to vector<1x64xf32>
    %c0_19 = arith.constant 0 : index
    %c6 = arith.constant 6 : index
    %c0_20 = arith.constant 0 : index
    %19 = vector.load %arg5[%c0_19, %c6, %c0_20] : memref<2x9x64xf32, #tpu.memory_space<vmem>>, vector<1x1x64xf32>
    %20 = vector.shape_cast %19 : vector<1x1x64xf32> to vector<1x64xf32>
    %c0_21 = arith.constant 0 : index
    %c7 = arith.constant 7 : index
    %c0_22 = arith.constant 0 : index
    %21 = vector.load %arg5[%c0_21, %c7, %c0_22] : memref<2x9x64xf32, #tpu.memory_space<vmem>>, vector<1x1x64xf32>
    %22 = vector.shape_cast %21 : vector<1x1x64xf32> to vector<1x64xf32>
    %c0_23 = arith.constant 0 : index
    %c8 = arith.constant 8 : index
    %c0_24 = arith.constant 0 : index
    %23 = vector.load %arg5[%c0_23, %c8, %c0_24] : memref<2x9x64xf32, #tpu.memory_space<vmem>>, vector<1x1x64xf32>
    %24 = vector.shape_cast %23 : vector<1x1x64xf32> to vector<1x64xf32>
    %cst_25 = arith.constant dense<0.000000e+00> : vector<5xf32>
    %25 = vector.multi_reduction <add>, %5, %cst_25 [1] : vector<5x64xf32> to vector<5xf32>
    %26 = vector.shape_cast %25 : vector<5xf32> to vector<5x1xf32>
    %cst_26 = arith.constant 6.400000e+01 : f32
    %27 = vector.broadcast %cst_26 : f32 to vector<5x1xf32>
    %28 = arith.divf %26, %27 : vector<5x1xf32>
    %29 = vector.broadcast %28 : vector<5x1xf32> to vector<5x64xf32>
    %30 = arith.subf %5, %29 : vector<5x64xf32>
    %31 = arith.mulf %30, %30 : vector<5x64xf32>
    %cst_27 = arith.constant dense<0.000000e+00> : vector<5xf32>
    %32 = vector.multi_reduction <add>, %31, %cst_27 [1] : vector<5x64xf32> to vector<5xf32>
    %33 = vector.shape_cast %32 : vector<5xf32> to vector<5x1xf32>
    %cst_28 = arith.constant 6.400000e+01 : f32
    %34 = vector.broadcast %cst_28 : f32 to vector<5x1xf32>
    %35 = arith.divf %33, %34 : vector<5x1xf32>
    %36 = vector.broadcast %28 : vector<5x1xf32> to vector<5x64xf32>
    %37 = arith.subf %5, %36 : vector<5x64xf32>
    %cst_29 = arith.constant 9.99999997E-7 : f32
    %38 = vector.broadcast %cst_29 : f32 to vector<5x1xf32>
    %39 = arith.addf %35, %38 : vector<5x1xf32>
    %40 = math.rsqrt %39 : vector<5x1xf32>
    %41 = vector.broadcast %40 : vector<5x1xf32> to vector<5x64xf32>
    %42 = arith.mulf %37, %41 : vector<5x64xf32>
    %43 = vector.broadcast %8 : vector<1x64xf32> to vector<5x64xf32>
    %44 = arith.mulf %42, %43 : vector<5x64xf32>
    %45 = vector.broadcast %10 : vector<1x64xf32> to vector<5x64xf32>
    %46 = arith.addf %44, %45 : vector<5x64xf32>
    %47 = arith.truncf %46 : vector<5x64xf32> to vector<5x64xbf16>
    %c0_30 = arith.constant 0 : index
    %c0_31 = arith.constant 0 : index
    %c0_32 = arith.constant 0 : index
    %c0_33 = arith.constant 0 : index
    %48 = vector.load %arg4[%c0_30, %c0_31, %c0_32, %c0_33] : memref<2x4x64x64xbf16, #tpu.memory_space<vmem>>, vector<1x1x64x64xbf16>
    %49 = vector.shape_cast %48 : vector<1x1x64x64xbf16> to vector<64x64xbf16>
    %cst_34 = arith.constant dense<0.000000e+00> : vector<5x64xf32>
    %50 = tpu.matmul %47, %49, %cst_34 {dimension_numbers = #tpu.dot_dimension_numbers<[1], [0], [0], [1], [0, 0, 1, 1], [], []>} : vector<5x64xbf16>, vector<64x64xbf16>, vector<5x64xf32> -> vector<5x64xf32>
    %51 = vector.broadcast %12 : vector<1x64xf32> to vector<5x64xf32>
    %52 = arith.addf %50, %51 : vector<5x64xf32>
    %c0_35 = arith.constant 0 : index
    %c1_36 = arith.constant 1 : index
    %c0_37 = arith.constant 0 : index
    %c0_38 = arith.constant 0 : index
    %53 = vector.load %arg4[%c0_35, %c1_36, %c0_37, %c0_38] : memref<2x4x64x64xbf16, #tpu.memory_space<vmem>>, vector<1x1x64x64xbf16>
    %54 = vector.shape_cast %53 : vector<1x1x64x64xbf16> to vector<64x64xbf16>
    %cst_39 = arith.constant dense<0.000000e+00> : vector<5x64xf32>
    %55 = tpu.matmul %47, %54, %cst_39 {dimension_numbers = #tpu.dot_dimension_numbers<[1], [0], [0], [1], [0, 0, 1, 1], [], []>} : vector<5x64xbf16>, vector<64x64xbf16>, vector<5x64xf32> -> vector<5x64xf32>
    %56 = vector.broadcast %14 : vector<1x64xf32> to vector<5x64xf32>
    %57 = arith.addf %55, %56 : vector<5x64xf32>
    %c0_40 = arith.constant 0 : index
    %c2_41 = arith.constant 2 : index
    %c0_42 = arith.constant 0 : index
    %c0_43 = arith.constant 0 : index
    %58 = vector.load %arg4[%c0_40, %c2_41, %c0_42, %c0_43] : memref<2x4x64x64xbf16, #tpu.memory_space<vmem>>, vector<1x1x64x64xbf16>
    %59 = vector.shape_cast %58 : vector<1x1x64x64xbf16> to vector<64x64xbf16>
    %cst_44 = arith.constant dense<0.000000e+00> : vector<5x64xf32>
    %60 = tpu.matmul %47, %59, %cst_44 {dimension_numbers = #tpu.dot_dimension_numbers<[1], [0], [0], [1], [0, 0, 1, 1], [], []>} : vector<5x64xbf16>, vector<64x64xbf16>, vector<5x64xf32> -> vector<5x64xf32>
    %61 = vector.broadcast %16 : vector<1x64xf32> to vector<5x64xf32>
    %62 = arith.addf %60, %61 : vector<5x64xf32>
    %63 = arith.truncf %52 : vector<5x64xf32> to vector<5x64xbf16>
    %cst_45 = arith.constant 0.000000e+00 : f32
    %64 = vector.broadcast %cst_45 : f32 to vector<5x64xf32>
    %c0_i32 = arith.constant 0 : i32
    %65 = vector.broadcast %c0_i32 : i32 to vector<1x64xi32>
    %66 = arith.cmpi sge, %6, %65 : vector<1x64xi32>
    %c16_i32 = arith.constant 16 : i32
    %67 = vector.broadcast %c16_i32 : i32 to vector<1x64xi32>
    %68 = arith.cmpi slt, %6, %67 : vector<1x64xi32>
    %69 = arith.andi %66, %68 : vector<1x64xi1>
    %cst_46 = arith.constant 0.000000e+00 : f32
    %70 = vector.shape_cast %69 : vector<1x64xi1> to vector<1x64xi1>
    %71 = vector.broadcast %70 : vector<1x64xi1> to vector<5x64xi1>
    %72 = vector.broadcast %cst_46 : f32 to vector<5x64xf32>
    %73 = arith.select %71, %57, %72 : vector<5x64xi1>, vector<5x64xf32>
    %74 = arith.truncf %73 : vector<5x64xf32> to vector<5x64xbf16>
    %cst_47 = arith.constant 0.000000e+00 : f32
    %75 = vector.shape_cast %69 : vector<1x64xi1> to vector<1x64xi1>
    %76 = vector.broadcast %75 : vector<1x64xi1> to vector<5x64xi1>
    %77 = vector.broadcast %cst_47 : f32 to vector<5x64xf32>
    %78 = arith.select %76, %62, %77 : vector<5x64xi1>, vector<5x64xf32>
    %79 = arith.truncf %78 : vector<5x64xf32> to vector<5x64xbf16>
    %cst_48 = arith.constant dense<0.000000e+00> : vector<5x5xf32>
    %80 = tpu.matmul %63, %74, %cst_48 {dimension_numbers = #tpu.dot_dimension_numbers<[1], [1], [0], [0], [0, 0, 1, 0], [], []>} : vector<5x64xbf16>, vector<5x64xbf16>, vector<5x5xf32> -> vector<5x5xf32>
    %cst_49 = arith.constant dense<0xFF800000> : vector<5xf32>
    %81 = vector.multi_reduction <maximumf>, %80, %cst_49 [1] : vector<5x5xf32> to vector<5xf32>
    %82 = vector.shape_cast %81 : vector<5xf32> to vector<5x1xf32>
    %83 = vector.broadcast %82 : vector<5x1xf32> to vector<5x5xf32>
    %84 = arith.subf %80, %83 : vector<5x5xf32>
    %85 = math.exp %84 : vector<5x5xf32>
    %cst_50 = arith.constant dense<0.000000e+00> : vector<5xf32>
    %86 = vector.multi_reduction <add>, %85, %cst_50 [1] : vector<5x5xf32> to vector<5xf32>
    %87 = vector.shape_cast %86 : vector<5xf32> to vector<5x1xf32>
    %88 = vector.broadcast %87 : vector<5x1xf32> to vector<5x5xf32>
    %89 = arith.divf %85, %88 : vector<5x5xf32>
    %90 = arith.truncf %89 : vector<5x5xf32> to vector<5x5xbf16>
    %cst_51 = arith.constant dense<0.000000e+00> : vector<5x64xf32>
    %91 = tpu.matmul %90, %79, %cst_51 {dimension_numbers = #tpu.dot_dimension_numbers<[1], [0], [0], [1], [0, 0, 1, 1], [], []>} : vector<5x5xbf16>, vector<5x64xbf16>, vector<5x64xf32> -> vector<5x64xf32>
    %92 = arith.addf %64, %91 : vector<5x64xf32>
    %c16_i32_52 = arith.constant 16 : i32
    %93 = vector.broadcast %c16_i32_52 : i32 to vector<1x64xi32>
    %94 = arith.cmpi sge, %6, %93 : vector<1x64xi32>
    %c32_i32 = arith.constant 32 : i32
    %95 = vector.broadcast %c32_i32 : i32 to vector<1x64xi32>
    %96 = arith.cmpi slt, %6, %95 : vector<1x64xi32>
    %97 = arith.andi %94, %96 : vector<1x64xi1>
    %cst_53 = arith.constant 0.000000e+00 : f32
    %98 = vector.shape_cast %97 : vector<1x64xi1> to vector<1x64xi1>
    %99 = vector.broadcast %98 : vector<1x64xi1> to vector<5x64xi1>
    %100 = vector.broadcast %cst_53 : f32 to vector<5x64xf32>
    %101 = arith.select %99, %57, %100 : vector<5x64xi1>, vector<5x64xf32>
    %102 = arith.truncf %101 : vector<5x64xf32> to vector<5x64xbf16>
    %cst_54 = arith.constant 0.000000e+00 : f32
    %103 = vector.shape_cast %97 : vector<1x64xi1> to vector<1x64xi1>
    %104 = vector.broadcast %103 : vector<1x64xi1> to vector<5x64xi1>
    %105 = vector.broadcast %cst_54 : f32 to vector<5x64xf32>
    %106 = arith.select %104, %62, %105 : vector<5x64xi1>, vector<5x64xf32>
    %107 = arith.truncf %106 : vector<5x64xf32> to vector<5x64xbf16>
    %cst_55 = arith.constant dense<0.000000e+00> : vector<5x5xf32>
    %108 = tpu.matmul %63, %102, %cst_55 {dimension_numbers = #tpu.dot_dimension_numbers<[1], [1], [0], [0], [0, 0, 1, 0], [], []>} : vector<5x64xbf16>, vector<5x64xbf16>, vector<5x5xf32> -> vector<5x5xf32>
    %cst_56 = arith.constant dense<0xFF800000> : vector<5xf32>
    %109 = vector.multi_reduction <maximumf>, %108, %cst_56 [1] : vector<5x5xf32> to vector<5xf32>
    %110 = vector.shape_cast %109 : vector<5xf32> to vector<5x1xf32>
    %111 = vector.broadcast %110 : vector<5x1xf32> to vector<5x5xf32>
    %112 = arith.subf %108, %111 : vector<5x5xf32>
    %113 = math.exp %112 : vector<5x5xf32>
    %cst_57 = arith.constant dense<0.000000e+00> : vector<5xf32>
    %114 = vector.multi_reduction <add>, %113, %cst_57 [1] : vector<5x5xf32> to vector<5xf32>
    %115 = vector.shape_cast %114 : vector<5xf32> to vector<5x1xf32>
    %116 = vector.broadcast %115 : vector<5x1xf32> to vector<5x5xf32>
    %117 = arith.divf %113, %116 : vector<5x5xf32>
    %118 = arith.truncf %117 : vector<5x5xf32> to vector<5x5xbf16>
    %cst_58 = arith.constant dense<0.000000e+00> : vector<5x64xf32>
    %119 = tpu.matmul %118, %107, %cst_58 {dimension_numbers = #tpu.dot_dimension_numbers<[1], [0], [0], [1], [0, 0, 1, 1], [], []>} : vector<5x5xbf16>, vector<5x64xbf16>, vector<5x64xf32> -> vector<5x64xf32>
    %120 = arith.addf %92, %119 : vector<5x64xf32>
    %c32_i32_59 = arith.constant 32 : i32
    %121 = vector.broadcast %c32_i32_59 : i32 to vector<1x64xi32>
    %122 = arith.cmpi sge, %6, %121 : vector<1x64xi32>
    %c48_i32 = arith.constant 48 : i32
    %123 = vector.broadcast %c48_i32 : i32 to vector<1x64xi32>
    %124 = arith.cmpi slt, %6, %123 : vector<1x64xi32>
    %125 = arith.andi %122, %124 : vector<1x64xi1>
    %cst_60 = arith.constant 0.000000e+00 : f32
    %126 = vector.shape_cast %125 : vector<1x64xi1> to vector<1x64xi1>
    %127 = vector.broadcast %126 : vector<1x64xi1> to vector<5x64xi1>
    %128 = vector.broadcast %cst_60 : f32 to vector<5x64xf32>
    %129 = arith.select %127, %57, %128 : vector<5x64xi1>, vector<5x64xf32>
    %130 = arith.truncf %129 : vector<5x64xf32> to vector<5x64xbf16>
    %cst_61 = arith.constant 0.000000e+00 : f32
    %131 = vector.shape_cast %125 : vector<1x64xi1> to vector<1x64xi1>
    %132 = vector.broadcast %131 : vector<1x64xi1> to vector<5x64xi1>
    %133 = vector.broadcast %cst_61 : f32 to vector<5x64xf32>
    %134 = arith.select %132, %62, %133 : vector<5x64xi1>, vector<5x64xf32>
    %135 = arith.truncf %134 : vector<5x64xf32> to vector<5x64xbf16>
    %cst_62 = arith.constant dense<0.000000e+00> : vector<5x5xf32>
    %136 = tpu.matmul %63, %130, %cst_62 {dimension_numbers = #tpu.dot_dimension_numbers<[1], [1], [0], [0], [0, 0, 1, 0], [], []>} : vector<5x64xbf16>, vector<5x64xbf16>, vector<5x5xf32> -> vector<5x5xf32>
    %cst_63 = arith.constant dense<0xFF800000> : vector<5xf32>
    %137 = vector.multi_reduction <maximumf>, %136, %cst_63 [1] : vector<5x5xf32> to vector<5xf32>
    %138 = vector.shape_cast %137 : vector<5xf32> to vector<5x1xf32>
    %139 = vector.broadcast %138 : vector<5x1xf32> to vector<5x5xf32>
    %140 = arith.subf %136, %139 : vector<5x5xf32>
    %141 = math.exp %140 : vector<5x5xf32>
    %cst_64 = arith.constant dense<0.000000e+00> : vector<5xf32>
    %142 = vector.multi_reduction <add>, %141, %cst_64 [1] : vector<5x5xf32> to vector<5xf32>
    %143 = vector.shape_cast %142 : vector<5xf32> to vector<5x1xf32>
    %144 = vector.broadcast %143 : vector<5x1xf32> to vector<5x5xf32>
    %145 = arith.divf %141, %144 : vector<5x5xf32>
    %146 = arith.truncf %145 : vector<5x5xf32> to vector<5x5xbf16>
    %cst_65 = arith.constant dense<0.000000e+00> : vector<5x64xf32>
    %147 = tpu.matmul %146, %135, %cst_65 {dimension_numbers = #tpu.dot_dimension_numbers<[1], [0], [0], [1], [0, 0, 1, 1], [], []>} : vector<5x5xbf16>, vector<5x64xbf16>, vector<5x64xf32> -> vector<5x64xf32>
    %148 = arith.addf %120, %147 : vector<5x64xf32>
    %c48_i32_66 = arith.constant 48 : i32
    %149 = vector.broadcast %c48_i32_66 : i32 to vector<1x64xi32>
    %150 = arith.cmpi sge, %6, %149 : vector<1x64xi32>
    %c64_i32 = arith.constant 64 : i32
    %151 = vector.broadcast %c64_i32 : i32 to vector<1x64xi32>
    %152 = arith.cmpi slt, %6, %151 : vector<1x64xi32>
    %153 = arith.andi %150, %152 : vector<1x64xi1>
    %cst_67 = arith.constant 0.000000e+00 : f32
    %154 = vector.shape_cast %153 : vector<1x64xi1> to vector<1x64xi1>
    %155 = vector.broadcast %154 : vector<1x64xi1> to vector<5x64xi1>
    %156 = vector.broadcast %cst_67 : f32 to vector<5x64xf32>
    %157 = arith.select %155, %57, %156 : vector<5x64xi1>, vector<5x64xf32>
    %158 = arith.truncf %157 : vector<5x64xf32> to vector<5x64xbf16>
    %cst_68 = arith.constant 0.000000e+00 : f32
    %159 = vector.shape_cast %153 : vector<1x64xi1> to vector<1x64xi1>
    %160 = vector.broadcast %159 : vector<1x64xi1> to vector<5x64xi1>
    %161 = vector.broadcast %cst_68 : f32 to vector<5x64xf32>
    %162 = arith.select %160, %62, %161 : vector<5x64xi1>, vector<5x64xf32>
    %163 = arith.truncf %162 : vector<5x64xf32> to vector<5x64xbf16>
    %cst_69 = arith.constant dense<0.000000e+00> : vector<5x5xf32>
    %164 = tpu.matmul %63, %158, %cst_69 {dimension_numbers = #tpu.dot_dimension_numbers<[1], [1], [0], [0], [0, 0, 1, 0], [], []>} : vector<5x64xbf16>, vector<5x64xbf16>, vector<5x5xf32> -> vector<5x5xf32>
    %cst_70 = arith.constant dense<0xFF800000> : vector<5xf32>
    %165 = vector.multi_reduction <maximumf>, %164, %cst_70 [1] : vector<5x5xf32> to vector<5xf32>
    %166 = vector.shape_cast %165 : vector<5xf32> to vector<5x1xf32>
    %167 = vector.broadcast %166 : vector<5x1xf32> to vector<5x5xf32>
    %168 = arith.subf %164, %167 : vector<5x5xf32>
    %169 = math.exp %168 : vector<5x5xf32>
    %cst_71 = arith.constant dense<0.000000e+00> : vector<5xf32>
    %170 = vector.multi_reduction <add>, %169, %cst_71 [1] : vector<5x5xf32> to vector<5xf32>
    %171 = vector.shape_cast %170 : vector<5xf32> to vector<5x1xf32>
    %172 = vector.broadcast %171 : vector<5x1xf32> to vector<5x5xf32>
    %173 = arith.divf %169, %172 : vector<5x5xf32>
    %174 = arith.truncf %173 : vector<5x5xf32> to vector<5x5xbf16>
    %cst_72 = arith.constant dense<0.000000e+00> : vector<5x64xf32>
    %175 = tpu.matmul %174, %163, %cst_72 {dimension_numbers = #tpu.dot_dimension_numbers<[1], [0], [0], [1], [0, 0, 1, 1], [], []>} : vector<5x5xbf16>, vector<5x64xbf16>, vector<5x64xf32> -> vector<5x64xf32>
    %176 = arith.addf %148, %175 : vector<5x64xf32>
    %177 = arith.truncf %176 : vector<5x64xf32> to vector<5x64xbf16>
    %c0_73 = arith.constant 0 : index
    %c3_74 = arith.constant 3 : index
    %c0_75 = arith.constant 0 : index
    %c0_76 = arith.constant 0 : index
    %178 = vector.load %arg4[%c0_73, %c3_74, %c0_75, %c0_76] : memref<2x4x64x64xbf16, #tpu.memory_space<vmem>>, vector<1x1x64x64xbf16>
    %179 = vector.shape_cast %178 : vector<1x1x64x64xbf16> to vector<64x64xbf16>
    %cst_77 = arith.constant dense<0.000000e+00> : vector<5x64xf32>
    %180 = tpu.matmul %177, %179, %cst_77 {dimension_numbers = #tpu.dot_dimension_numbers<[1], [0], [0], [1], [0, 0, 1, 1], [], []>} : vector<5x64xbf16>, vector<64x64xbf16>, vector<5x64xf32> -> vector<5x64xf32>
    %181 = vector.broadcast %18 : vector<1x64xf32> to vector<5x64xf32>
    %182 = arith.addf %180, %181 : vector<5x64xf32>
    %183 = arith.addf %182, %5 : vector<5x64xf32>
    %cst_78 = arith.constant dense<0.000000e+00> : vector<5xf32>
    %184 = vector.multi_reduction <add>, %183, %cst_78 [1] : vector<5x64xf32> to vector<5xf32>
    %185 = vector.shape_cast %184 : vector<5xf32> to vector<5x1xf32>
    %cst_79 = arith.constant 6.400000e+01 : f32
    %186 = vector.broadcast %cst_79 : f32 to vector<5x1xf32>
    %187 = arith.divf %185, %186 : vector<5x1xf32>
    %188 = vector.broadcast %187 : vector<5x1xf32> to vector<5x64xf32>
    %189 = arith.subf %183, %188 : vector<5x64xf32>
    %190 = arith.mulf %189, %189 : vector<5x64xf32>
    %cst_80 = arith.constant dense<0.000000e+00> : vector<5xf32>
    %191 = vector.multi_reduction <add>, %190, %cst_80 [1] : vector<5x64xf32> to vector<5xf32>
    %192 = vector.shape_cast %191 : vector<5xf32> to vector<5x1xf32>
    %cst_81 = arith.constant 6.400000e+01 : f32
    %193 = vector.broadcast %cst_81 : f32 to vector<5x1xf32>
    %194 = arith.divf %192, %193 : vector<5x1xf32>
    %195 = vector.broadcast %187 : vector<5x1xf32> to vector<5x64xf32>
    %196 = arith.subf %183, %195 : vector<5x64xf32>
    %cst_82 = arith.constant 9.99999997E-7 : f32
    %197 = vector.broadcast %cst_82 : f32 to vector<5x1xf32>
    %198 = arith.addf %194, %197 : vector<5x1xf32>
    %199 = math.rsqrt %198 : vector<5x1xf32>
    %200 = vector.broadcast %199 : vector<5x1xf32> to vector<5x64xf32>
    %201 = arith.mulf %196, %200 : vector<5x64xf32>
    %202 = vector.broadcast %20 : vector<1x64xf32> to vector<5x64xf32>
    %203 = arith.mulf %201, %202 : vector<5x64xf32>
    %204 = vector.broadcast %22 : vector<1x64xf32> to vector<5x64xf32>
    %205 = arith.addf %203, %204 : vector<5x64xf32>
    %206 = arith.truncf %205 : vector<5x64xf32> to vector<5x64xbf16>
    %c0_83 = arith.constant 0 : index
    %c0_84 = arith.constant 0 : index
    %c0_85 = arith.constant 0 : index
    %207 = vector.load %arg6[%c0_83, %c0_84, %c0_85] : memref<2x64x256xbf16, #tpu.memory_space<vmem>>, vector<1x64x256xbf16>
    %208 = vector.shape_cast %207 : vector<1x64x256xbf16> to vector<64x256xbf16>
    %cst_86 = arith.constant dense<0.000000e+00> : vector<5x256xf32>
    %209 = tpu.matmul %206, %208, %cst_86 {dimension_numbers = #tpu.dot_dimension_numbers<[1], [0], [0], [1], [0, 0, 1, 1], [], []>} : vector<5x64xbf16>, vector<64x256xbf16>, vector<5x256xf32> -> vector<5x256xf32>
    %c0_87 = arith.constant 0 : index
    %c0_88 = arith.constant 0 : index
    %c0_89 = arith.constant 0 : index
    %210 = vector.load %arg7[%c0_87, %c0_88, %c0_89] : memref<2x1x256xf32, #tpu.memory_space<vmem>>, vector<1x1x256xf32>
    %211 = vector.shape_cast %210 : vector<1x1x256xf32> to vector<1x256xf32>
    %212 = vector.broadcast %211 : vector<1x256xf32> to vector<5x256xf32>
    %213 = arith.addf %209, %212 : vector<5x256xf32>
    %cst_90 = arith.constant 5.000000e-01 : f32
    %214 = vector.broadcast %cst_90 : f32 to vector<5x256xf32>
    %215 = arith.mulf %214, %213 : vector<5x256xf32>
    %cst_91 = arith.constant 2.000000e+00 : f32
    %216 = math.sqrt %cst_91 : f32
    %cst_92 = arith.constant 1.000000e+00 : f32
    %217 = arith.divf %cst_92, %216 : f32
    %218 = vector.broadcast %217 : f32 to vector<5x256xf32>
    %219 = arith.mulf %213, %218 : vector<5x256xf32>
    %220 = math.erf %219 : vector<5x256xf32>
    %cst_93 = arith.constant 1.000000e+00 : f32
    %221 = vector.broadcast %cst_93 : f32 to vector<5x256xf32>
    %222 = arith.addf %221, %220 : vector<5x256xf32>
    %223 = arith.mulf %215, %222 : vector<5x256xf32>
    %224 = arith.truncf %223 : vector<5x256xf32> to vector<5x256xbf16>
    %c0_94 = arith.constant 0 : index
    %c0_95 = arith.constant 0 : index
    %c0_96 = arith.constant 0 : index
    %225 = vector.load %arg8[%c0_94, %c0_95, %c0_96] : memref<2x256x64xbf16, #tpu.memory_space<vmem>>, vector<1x256x64xbf16>
    %226 = vector.shape_cast %225 : vector<1x256x64xbf16> to vector<256x64xbf16>
    %cst_97 = arith.constant dense<0.000000e+00> : vector<5x64xf32>
    %227 = tpu.matmul %224, %226, %cst_97 {dimension_numbers = #tpu.dot_dimension_numbers<[1], [0], [0], [1], [0, 0, 1, 1], [], []>} : vector<5x256xbf16>, vector<256x64xbf16>, vector<5x64xf32> -> vector<5x64xf32>
    %228 = vector.broadcast %24 : vector<1x64xf32> to vector<5x64xf32>
    %229 = arith.addf %227, %228 : vector<5x64xf32>
    %230 = arith.addf %229, %183 : vector<5x64xf32>
    %c1_98 = arith.constant 1 : index
    %c0_99 = arith.constant 0 : index
    %c0_100 = arith.constant 0 : index
    %231 = vector.load %arg5[%c1_98, %c0_99, %c0_100] : memref<2x9x64xf32, #tpu.memory_space<vmem>>, vector<1x1x64xf32>
    %232 = vector.shape_cast %231 : vector<1x1x64xf32> to vector<1x64xf32>
    %c1_101 = arith.constant 1 : index
    %c1_102 = arith.constant 1 : index
    %c0_103 = arith.constant 0 : index
    %233 = vector.load %arg5[%c1_101, %c1_102, %c0_103] : memref<2x9x64xf32, #tpu.memory_space<vmem>>, vector<1x1x64xf32>
    %234 = vector.shape_cast %233 : vector<1x1x64xf32> to vector<1x64xf32>
    %c1_104 = arith.constant 1 : index
    %c2_105 = arith.constant 2 : index
    %c0_106 = arith.constant 0 : index
    %235 = vector.load %arg5[%c1_104, %c2_105, %c0_106] : memref<2x9x64xf32, #tpu.memory_space<vmem>>, vector<1x1x64xf32>
    %236 = vector.shape_cast %235 : vector<1x1x64xf32> to vector<1x64xf32>
    %c1_107 = arith.constant 1 : index
    %c3_108 = arith.constant 3 : index
    %c0_109 = arith.constant 0 : index
    %237 = vector.load %arg5[%c1_107, %c3_108, %c0_109] : memref<2x9x64xf32, #tpu.memory_space<vmem>>, vector<1x1x64xf32>
    %238 = vector.shape_cast %237 : vector<1x1x64xf32> to vector<1x64xf32>
    %c1_110 = arith.constant 1 : index
    %c4_111 = arith.constant 4 : index
    %c0_112 = arith.constant 0 : index
    %239 = vector.load %arg5[%c1_110, %c4_111, %c0_112] : memref<2x9x64xf32, #tpu.memory_space<vmem>>, vector<1x1x64xf32>
    %240 = vector.shape_cast %239 : vector<1x1x64xf32> to vector<1x64xf32>
    %c1_113 = arith.constant 1 : index
    %c5_114 = arith.constant 5 : index
    %c0_115 = arith.constant 0 : index
    %241 = vector.load %arg5[%c1_113, %c5_114, %c0_115] : memref<2x9x64xf32, #tpu.memory_space<vmem>>, vector<1x1x64xf32>
    %242 = vector.shape_cast %241 : vector<1x1x64xf32> to vector<1x64xf32>
    %c1_116 = arith.constant 1 : index
    %c6_117 = arith.constant 6 : index
    %c0_118 = arith.constant 0 : index
    %243 = vector.load %arg5[%c1_116, %c6_117, %c0_118] : memref<2x9x64xf32, #tpu.memory_space<vmem>>, vector<1x1x64xf32>
    %244 = vector.shape_cast %243 : vector<1x1x64xf32> to vector<1x64xf32>
    %c1_119 = arith.constant 1 : index
    %c7_120 = arith.constant 7 : index
    %c0_121 = arith.constant 0 : index
    %245 = vector.load %arg5[%c1_119, %c7_120, %c0_121] : memref<2x9x64xf32, #tpu.memory_space<vmem>>, vector<1x1x64xf32>
    %246 = vector.shape_cast %245 : vector<1x1x64xf32> to vector<1x64xf32>
    %c1_122 = arith.constant 1 : index
    %c8_123 = arith.constant 8 : index
    %c0_124 = arith.constant 0 : index
    %247 = vector.load %arg5[%c1_122, %c8_123, %c0_124] : memref<2x9x64xf32, #tpu.memory_space<vmem>>, vector<1x1x64xf32>
    %248 = vector.shape_cast %247 : vector<1x1x64xf32> to vector<1x64xf32>
    %cst_125 = arith.constant dense<0.000000e+00> : vector<5xf32>
    %249 = vector.multi_reduction <add>, %230, %cst_125 [1] : vector<5x64xf32> to vector<5xf32>
    %250 = vector.shape_cast %249 : vector<5xf32> to vector<5x1xf32>
    %cst_126 = arith.constant 6.400000e+01 : f32
    %251 = vector.broadcast %cst_126 : f32 to vector<5x1xf32>
    %252 = arith.divf %250, %251 : vector<5x1xf32>
    %253 = vector.broadcast %252 : vector<5x1xf32> to vector<5x64xf32>
    %254 = arith.subf %230, %253 : vector<5x64xf32>
    %255 = arith.mulf %254, %254 : vector<5x64xf32>
    %cst_127 = arith.constant dense<0.000000e+00> : vector<5xf32>
    %256 = vector.multi_reduction <add>, %255, %cst_127 [1] : vector<5x64xf32> to vector<5xf32>
    %257 = vector.shape_cast %256 : vector<5xf32> to vector<5x1xf32>
    %cst_128 = arith.constant 6.400000e+01 : f32
    %258 = vector.broadcast %cst_128 : f32 to vector<5x1xf32>
    %259 = arith.divf %257, %258 : vector<5x1xf32>
    %260 = vector.broadcast %252 : vector<5x1xf32> to vector<5x64xf32>
    %261 = arith.subf %230, %260 : vector<5x64xf32>
    %cst_129 = arith.constant 9.99999997E-7 : f32
    %262 = vector.broadcast %cst_129 : f32 to vector<5x1xf32>
    %263 = arith.addf %259, %262 : vector<5x1xf32>
    %264 = math.rsqrt %263 : vector<5x1xf32>
    %265 = vector.broadcast %264 : vector<5x1xf32> to vector<5x64xf32>
    %266 = arith.mulf %261, %265 : vector<5x64xf32>
    %267 = vector.broadcast %232 : vector<1x64xf32> to vector<5x64xf32>
    %268 = arith.mulf %266, %267 : vector<5x64xf32>
    %269 = vector.broadcast %234 : vector<1x64xf32> to vector<5x64xf32>
    %270 = arith.addf %268, %269 : vector<5x64xf32>
    %271 = arith.truncf %270 : vector<5x64xf32> to vector<5x64xbf16>
    %c1_130 = arith.constant 1 : index
    %c0_131 = arith.constant 0 : index
    %c0_132 = arith.constant 0 : index
    %c0_133 = arith.constant 0 : index
    %272 = vector.load %arg4[%c1_130, %c0_131, %c0_132, %c0_133] : memref<2x4x64x64xbf16, #tpu.memory_space<vmem>>, vector<1x1x64x64xbf16>
    %273 = vector.shape_cast %272 : vector<1x1x64x64xbf16> to vector<64x64xbf16>
    %cst_134 = arith.constant dense<0.000000e+00> : vector<5x64xf32>
    %274 = tpu.matmul %271, %273, %cst_134 {dimension_numbers = #tpu.dot_dimension_numbers<[1], [0], [0], [1], [0, 0, 1, 1], [], []>} : vector<5x64xbf16>, vector<64x64xbf16>, vector<5x64xf32> -> vector<5x64xf32>
    %275 = vector.broadcast %236 : vector<1x64xf32> to vector<5x64xf32>
    %276 = arith.addf %274, %275 : vector<5x64xf32>
    %c1_135 = arith.constant 1 : index
    %c1_136 = arith.constant 1 : index
    %c0_137 = arith.constant 0 : index
    %c0_138 = arith.constant 0 : index
    %277 = vector.load %arg4[%c1_135, %c1_136, %c0_137, %c0_138] : memref<2x4x64x64xbf16, #tpu.memory_space<vmem>>, vector<1x1x64x64xbf16>
    %278 = vector.shape_cast %277 : vector<1x1x64x64xbf16> to vector<64x64xbf16>
    %cst_139 = arith.constant dense<0.000000e+00> : vector<5x64xf32>
    %279 = tpu.matmul %271, %278, %cst_139 {dimension_numbers = #tpu.dot_dimension_numbers<[1], [0], [0], [1], [0, 0, 1, 1], [], []>} : vector<5x64xbf16>, vector<64x64xbf16>, vector<5x64xf32> -> vector<5x64xf32>
    %280 = vector.broadcast %238 : vector<1x64xf32> to vector<5x64xf32>
    %281 = arith.addf %279, %280 : vector<5x64xf32>
    %c1_140 = arith.constant 1 : index
    %c2_141 = arith.constant 2 : index
    %c0_142 = arith.constant 0 : index
    %c0_143 = arith.constant 0 : index
    %282 = vector.load %arg4[%c1_140, %c2_141, %c0_142, %c0_143] : memref<2x4x64x64xbf16, #tpu.memory_space<vmem>>, vector<1x1x64x64xbf16>
    %283 = vector.shape_cast %282 : vector<1x1x64x64xbf16> to vector<64x64xbf16>
    %cst_144 = arith.constant dense<0.000000e+00> : vector<5x64xf32>
    %284 = tpu.matmul %271, %283, %cst_144 {dimension_numbers = #tpu.dot_dimension_numbers<[1], [0], [0], [1], [0, 0, 1, 1], [], []>} : vector<5x64xbf16>, vector<64x64xbf16>, vector<5x64xf32> -> vector<5x64xf32>
    %285 = vector.broadcast %240 : vector<1x64xf32> to vector<5x64xf32>
    %286 = arith.addf %284, %285 : vector<5x64xf32>
    %287 = arith.truncf %276 : vector<5x64xf32> to vector<5x64xbf16>
    %cst_145 = arith.constant 0.000000e+00 : f32
    %288 = vector.broadcast %cst_145 : f32 to vector<5x64xf32>
    %c0_i32_146 = arith.constant 0 : i32
    %289 = vector.broadcast %c0_i32_146 : i32 to vector<1x64xi32>
    %290 = arith.cmpi sge, %6, %289 : vector<1x64xi32>
    %c16_i32_147 = arith.constant 16 : i32
    %291 = vector.broadcast %c16_i32_147 : i32 to vector<1x64xi32>
    %292 = arith.cmpi slt, %6, %291 : vector<1x64xi32>
    %293 = arith.andi %290, %292 : vector<1x64xi1>
    %cst_148 = arith.constant 0.000000e+00 : f32
    %294 = vector.shape_cast %293 : vector<1x64xi1> to vector<1x64xi1>
    %295 = vector.broadcast %294 : vector<1x64xi1> to vector<5x64xi1>
    %296 = vector.broadcast %cst_148 : f32 to vector<5x64xf32>
    %297 = arith.select %295, %281, %296 : vector<5x64xi1>, vector<5x64xf32>
    %298 = arith.truncf %297 : vector<5x64xf32> to vector<5x64xbf16>
    %cst_149 = arith.constant 0.000000e+00 : f32
    %299 = vector.shape_cast %293 : vector<1x64xi1> to vector<1x64xi1>
    %300 = vector.broadcast %299 : vector<1x64xi1> to vector<5x64xi1>
    %301 = vector.broadcast %cst_149 : f32 to vector<5x64xf32>
    %302 = arith.select %300, %286, %301 : vector<5x64xi1>, vector<5x64xf32>
    %303 = arith.truncf %302 : vector<5x64xf32> to vector<5x64xbf16>
    %cst_150 = arith.constant dense<0.000000e+00> : vector<5x5xf32>
    %304 = tpu.matmul %287, %298, %cst_150 {dimension_numbers = #tpu.dot_dimension_numbers<[1], [1], [0], [0], [0, 0, 1, 0], [], []>} : vector<5x64xbf16>, vector<5x64xbf16>, vector<5x5xf32> -> vector<5x5xf32>
    %cst_151 = arith.constant dense<0xFF800000> : vector<5xf32>
    %305 = vector.multi_reduction <maximumf>, %304, %cst_151 [1] : vector<5x5xf32> to vector<5xf32>
    %306 = vector.shape_cast %305 : vector<5xf32> to vector<5x1xf32>
    %307 = vector.broadcast %306 : vector<5x1xf32> to vector<5x5xf32>
    %308 = arith.subf %304, %307 : vector<5x5xf32>
    %309 = math.exp %308 : vector<5x5xf32>
    %cst_152 = arith.constant dense<0.000000e+00> : vector<5xf32>
    %310 = vector.multi_reduction <add>, %309, %cst_152 [1] : vector<5x5xf32> to vector<5xf32>
    %311 = vector.shape_cast %310 : vector<5xf32> to vector<5x1xf32>
    %312 = vector.broadcast %311 : vector<5x1xf32> to vector<5x5xf32>
    %313 = arith.divf %309, %312 : vector<5x5xf32>
    %314 = arith.truncf %313 : vector<5x5xf32> to vector<5x5xbf16>
    %cst_153 = arith.constant dense<0.000000e+00> : vector<5x64xf32>
    %315 = tpu.matmul %314, %303, %cst_153 {dimension_numbers = #tpu.dot_dimension_numbers<[1], [0], [0], [1], [0, 0, 1, 1], [], []>} : vector<5x5xbf16>, vector<5x64xbf16>, vector<5x64xf32> -> vector<5x64xf32>
    %316 = arith.addf %288, %315 : vector<5x64xf32>
    %c16_i32_154 = arith.constant 16 : i32
    %317 = vector.broadcast %c16_i32_154 : i32 to vector<1x64xi32>
    %318 = arith.cmpi sge, %6, %317 : vector<1x64xi32>
    %c32_i32_155 = arith.constant 32 : i32
    %319 = vector.broadcast %c32_i32_155 : i32 to vector<1x64xi32>
    %320 = arith.cmpi slt, %6, %319 : vector<1x64xi32>
    %321 = arith.andi %318, %320 : vector<1x64xi1>
    %cst_156 = arith.constant 0.000000e+00 : f32
    %322 = vector.shape_cast %321 : vector<1x64xi1> to vector<1x64xi1>
    %323 = vector.broadcast %322 : vector<1x64xi1> to vector<5x64xi1>
    %324 = vector.broadcast %cst_156 : f32 to vector<5x64xf32>
    %325 = arith.select %323, %281, %324 : vector<5x64xi1>, vector<5x64xf32>
    %326 = arith.truncf %325 : vector<5x64xf32> to vector<5x64xbf16>
    %cst_157 = arith.constant 0.000000e+00 : f32
    %327 = vector.shape_cast %321 : vector<1x64xi1> to vector<1x64xi1>
    %328 = vector.broadcast %327 : vector<1x64xi1> to vector<5x64xi1>
    %329 = vector.broadcast %cst_157 : f32 to vector<5x64xf32>
    %330 = arith.select %328, %286, %329 : vector<5x64xi1>, vector<5x64xf32>
    %331 = arith.truncf %330 : vector<5x64xf32> to vector<5x64xbf16>
    %cst_158 = arith.constant dense<0.000000e+00> : vector<5x5xf32>
    %332 = tpu.matmul %287, %326, %cst_158 {dimension_numbers = #tpu.dot_dimension_numbers<[1], [1], [0], [0], [0, 0, 1, 0], [], []>} : vector<5x64xbf16>, vector<5x64xbf16>, vector<5x5xf32> -> vector<5x5xf32>
    %cst_159 = arith.constant dense<0xFF800000> : vector<5xf32>
    %333 = vector.multi_reduction <maximumf>, %332, %cst_159 [1] : vector<5x5xf32> to vector<5xf32>
    %334 = vector.shape_cast %333 : vector<5xf32> to vector<5x1xf32>
    %335 = vector.broadcast %334 : vector<5x1xf32> to vector<5x5xf32>
    %336 = arith.subf %332, %335 : vector<5x5xf32>
    %337 = math.exp %336 : vector<5x5xf32>
    %cst_160 = arith.constant dense<0.000000e+00> : vector<5xf32>
    %338 = vector.multi_reduction <add>, %337, %cst_160 [1] : vector<5x5xf32> to vector<5xf32>
    %339 = vector.shape_cast %338 : vector<5xf32> to vector<5x1xf32>
    %340 = vector.broadcast %339 : vector<5x1xf32> to vector<5x5xf32>
    %341 = arith.divf %337, %340 : vector<5x5xf32>
    %342 = arith.truncf %341 : vector<5x5xf32> to vector<5x5xbf16>
    %cst_161 = arith.constant dense<0.000000e+00> : vector<5x64xf32>
    %343 = tpu.matmul %342, %331, %cst_161 {dimension_numbers = #tpu.dot_dimension_numbers<[1], [0], [0], [1], [0, 0, 1, 1], [], []>} : vector<5x5xbf16>, vector<5x64xbf16>, vector<5x64xf32> -> vector<5x64xf32>
    %344 = arith.addf %316, %343 : vector<5x64xf32>
    %c32_i32_162 = arith.constant 32 : i32
    %345 = vector.broadcast %c32_i32_162 : i32 to vector<1x64xi32>
    %346 = arith.cmpi sge, %6, %345 : vector<1x64xi32>
    %c48_i32_163 = arith.constant 48 : i32
    %347 = vector.broadcast %c48_i32_163 : i32 to vector<1x64xi32>
    %348 = arith.cmpi slt, %6, %347 : vector<1x64xi32>
    %349 = arith.andi %346, %348 : vector<1x64xi1>
    %cst_164 = arith.constant 0.000000e+00 : f32
    %350 = vector.shape_cast %349 : vector<1x64xi1> to vector<1x64xi1>
    %351 = vector.broadcast %350 : vector<1x64xi1> to vector<5x64xi1>
    %352 = vector.broadcast %cst_164 : f32 to vector<5x64xf32>
    %353 = arith.select %351, %281, %352 : vector<5x64xi1>, vector<5x64xf32>
    %354 = arith.truncf %353 : vector<5x64xf32> to vector<5x64xbf16>
    %cst_165 = arith.constant 0.000000e+00 : f32
    %355 = vector.shape_cast %349 : vector<1x64xi1> to vector<1x64xi1>
    %356 = vector.broadcast %355 : vector<1x64xi1> to vector<5x64xi1>
    %357 = vector.broadcast %cst_165 : f32 to vector<5x64xf32>
    %358 = arith.select %356, %286, %357 : vector<5x64xi1>, vector<5x64xf32>
    %359 = arith.truncf %358 : vector<5x64xf32> to vector<5x64xbf16>
    %cst_166 = arith.constant dense<0.000000e+00> : vector<5x5xf32>
    %360 = tpu.matmul %287, %354, %cst_166 {dimension_numbers = #tpu.dot_dimension_numbers<[1], [1], [0], [0], [0, 0, 1, 0], [], []>} : vector<5x64xbf16>, vector<5x64xbf16>, vector<5x5xf32> -> vector<5x5xf32>
    %cst_167 = arith.constant dense<0xFF800000> : vector<5xf32>
    %361 = vector.multi_reduction <maximumf>, %360, %cst_167 [1] : vector<5x5xf32> to vector<5xf32>
    %362 = vector.shape_cast %361 : vector<5xf32> to vector<5x1xf32>
    %363 = vector.broadcast %362 : vector<5x1xf32> to vector<5x5xf32>
    %364 = arith.subf %360, %363 : vector<5x5xf32>
    %365 = math.exp %364 : vector<5x5xf32>
    %cst_168 = arith.constant dense<0.000000e+00> : vector<5xf32>
    %366 = vector.multi_reduction <add>, %365, %cst_168 [1] : vector<5x5xf32> to vector<5xf32>
    %367 = vector.shape_cast %366 : vector<5xf32> to vector<5x1xf32>
    %368 = vector.broadcast %367 : vector<5x1xf32> to vector<5x5xf32>
    %369 = arith.divf %365, %368 : vector<5x5xf32>
    %370 = arith.truncf %369 : vector<5x5xf32> to vector<5x5xbf16>
    %cst_169 = arith.constant dense<0.000000e+00> : vector<5x64xf32>
    %371 = tpu.matmul %370, %359, %cst_169 {dimension_numbers = #tpu.dot_dimension_numbers<[1], [0], [0], [1], [0, 0, 1, 1], [], []>} : vector<5x5xbf16>, vector<5x64xbf16>, vector<5x64xf32> -> vector<5x64xf32>
    %372 = arith.addf %344, %371 : vector<5x64xf32>
    %c48_i32_170 = arith.constant 48 : i32
    %373 = vector.broadcast %c48_i32_170 : i32 to vector<1x64xi32>
    %374 = arith.cmpi sge, %6, %373 : vector<1x64xi32>
    %c64_i32_171 = arith.constant 64 : i32
    %375 = vector.broadcast %c64_i32_171 : i32 to vector<1x64xi32>
    %376 = arith.cmpi slt, %6, %375 : vector<1x64xi32>
    %377 = arith.andi %374, %376 : vector<1x64xi1>
    %cst_172 = arith.constant 0.000000e+00 : f32
    %378 = vector.shape_cast %377 : vector<1x64xi1> to vector<1x64xi1>
    %379 = vector.broadcast %378 : vector<1x64xi1> to vector<5x64xi1>
    %380 = vector.broadcast %cst_172 : f32 to vector<5x64xf32>
    %381 = arith.select %379, %281, %380 : vector<5x64xi1>, vector<5x64xf32>
    %382 = arith.truncf %381 : vector<5x64xf32> to vector<5x64xbf16>
    %cst_173 = arith.constant 0.000000e+00 : f32
    %383 = vector.shape_cast %377 : vector<1x64xi1> to vector<1x64xi1>
    %384 = vector.broadcast %383 : vector<1x64xi1> to vector<5x64xi1>
    %385 = vector.broadcast %cst_173 : f32 to vector<5x64xf32>
    %386 = arith.select %384, %286, %385 : vector<5x64xi1>, vector<5x64xf32>
    %387 = arith.truncf %386 : vector<5x64xf32> to vector<5x64xbf16>
    %cst_174 = arith.constant dense<0.000000e+00> : vector<5x5xf32>
    %388 = tpu.matmul %287, %382, %cst_174 {dimension_numbers = #tpu.dot_dimension_numbers<[1], [1], [0], [0], [0, 0, 1, 0], [], []>} : vector<5x64xbf16>, vector<5x64xbf16>, vector<5x5xf32> -> vector<5x5xf32>
    %cst_175 = arith.constant dense<0xFF800000> : vector<5xf32>
    %389 = vector.multi_reduction <maximumf>, %388, %cst_175 [1] : vector<5x5xf32> to vector<5xf32>
    %390 = vector.shape_cast %389 : vector<5xf32> to vector<5x1xf32>
    %391 = vector.broadcast %390 : vector<5x1xf32> to vector<5x5xf32>
    %392 = arith.subf %388, %391 : vector<5x5xf32>
    %393 = math.exp %392 : vector<5x5xf32>
    %cst_176 = arith.constant dense<0.000000e+00> : vector<5xf32>
    %394 = vector.multi_reduction <add>, %393, %cst_176 [1] : vector<5x5xf32> to vector<5xf32>
    %395 = vector.shape_cast %394 : vector<5xf32> to vector<5x1xf32>
    %396 = vector.broadcast %395 : vector<5x1xf32> to vector<5x5xf32>
    %397 = arith.divf %393, %396 : vector<5x5xf32>
    %398 = arith.truncf %397 : vector<5x5xf32> to vector<5x5xbf16>
    %cst_177 = arith.constant dense<0.000000e+00> : vector<5x64xf32>
    %399 = tpu.matmul %398, %387, %cst_177 {dimension_numbers = #tpu.dot_dimension_numbers<[1], [0], [0], [1], [0, 0, 1, 1], [], []>} : vector<5x5xbf16>, vector<5x64xbf16>, vector<5x64xf32> -> vector<5x64xf32>
    %400 = arith.addf %372, %399 : vector<5x64xf32>
    %401 = arith.truncf %400 : vector<5x64xf32> to vector<5x64xbf16>
    %c1_178 = arith.constant 1 : index
    %c3_179 = arith.constant 3 : index
    %c0_180 = arith.constant 0 : index
    %c0_181 = arith.constant 0 : index
    %402 = vector.load %arg4[%c1_178, %c3_179, %c0_180, %c0_181] : memref<2x4x64x64xbf16, #tpu.memory_space<vmem>>, vector<1x1x64x64xbf16>
    %403 = vector.shape_cast %402 : vector<1x1x64x64xbf16> to vector<64x64xbf16>
    %cst_182 = arith.constant dense<0.000000e+00> : vector<5x64xf32>
    %404 = tpu.matmul %401, %403, %cst_182 {dimension_numbers = #tpu.dot_dimension_numbers<[1], [0], [0], [1], [0, 0, 1, 1], [], []>} : vector<5x64xbf16>, vector<64x64xbf16>, vector<5x64xf32> -> vector<5x64xf32>
    %405 = vector.broadcast %242 : vector<1x64xf32> to vector<5x64xf32>
    %406 = arith.addf %404, %405 : vector<5x64xf32>
    %407 = arith.addf %406, %230 : vector<5x64xf32>
    %cst_183 = arith.constant dense<0.000000e+00> : vector<5xf32>
    %408 = vector.multi_reduction <add>, %407, %cst_183 [1] : vector<5x64xf32> to vector<5xf32>
    %409 = vector.shape_cast %408 : vector<5xf32> to vector<5x1xf32>
    %cst_184 = arith.constant 6.400000e+01 : f32
    %410 = vector.broadcast %cst_184 : f32 to vector<5x1xf32>
    %411 = arith.divf %409, %410 : vector<5x1xf32>
    %412 = vector.broadcast %411 : vector<5x1xf32> to vector<5x64xf32>
    %413 = arith.subf %407, %412 : vector<5x64xf32>
    %414 = arith.mulf %413, %413 : vector<5x64xf32>
    %cst_185 = arith.constant dense<0.000000e+00> : vector<5xf32>
    %415 = vector.multi_reduction <add>, %414, %cst_185 [1] : vector<5x64xf32> to vector<5xf32>
    %416 = vector.shape_cast %415 : vector<5xf32> to vector<5x1xf32>
    %cst_186 = arith.constant 6.400000e+01 : f32
    %417 = vector.broadcast %cst_186 : f32 to vector<5x1xf32>
    %418 = arith.divf %416, %417 : vector<5x1xf32>
    %419 = vector.broadcast %411 : vector<5x1xf32> to vector<5x64xf32>
    %420 = arith.subf %407, %419 : vector<5x64xf32>
    %cst_187 = arith.constant 9.99999997E-7 : f32
    %421 = vector.broadcast %cst_187 : f32 to vector<5x1xf32>
    %422 = arith.addf %418, %421 : vector<5x1xf32>
    %423 = math.rsqrt %422 : vector<5x1xf32>
    %424 = vector.broadcast %423 : vector<5x1xf32> to vector<5x64xf32>
    %425 = arith.mulf %420, %424 : vector<5x64xf32>
    %426 = vector.broadcast %244 : vector<1x64xf32> to vector<5x64xf32>
    %427 = arith.mulf %425, %426 : vector<5x64xf32>
    %428 = vector.broadcast %246 : vector<1x64xf32> to vector<5x64xf32>
    %429 = arith.addf %427, %428 : vector<5x64xf32>
    %430 = arith.truncf %429 : vector<5x64xf32> to vector<5x64xbf16>
    %c1_188 = arith.constant 1 : index
    %c0_189 = arith.constant 0 : index
    %c0_190 = arith.constant 0 : index
    %431 = vector.load %arg6[%c1_188, %c0_189, %c0_190] : memref<2x64x256xbf16, #tpu.memory_space<vmem>>, vector<1x64x256xbf16>
    %432 = vector.shape_cast %431 : vector<1x64x256xbf16> to vector<64x256xbf16>
    %cst_191 = arith.constant dense<0.000000e+00> : vector<5x256xf32>
    %433 = tpu.matmul %430, %432, %cst_191 {dimension_numbers = #tpu.dot_dimension_numbers<[1], [0], [0], [1], [0, 0, 1, 1], [], []>} : vector<5x64xbf16>, vector<64x256xbf16>, vector<5x256xf32> -> vector<5x256xf32>
    %c1_192 = arith.constant 1 : index
    %c0_193 = arith.constant 0 : index
    %c0_194 = arith.constant 0 : index
    %434 = vector.load %arg7[%c1_192, %c0_193, %c0_194] : memref<2x1x256xf32, #tpu.memory_space<vmem>>, vector<1x1x256xf32>
    %435 = vector.shape_cast %434 : vector<1x1x256xf32> to vector<1x256xf32>
    %436 = vector.broadcast %435 : vector<1x256xf32> to vector<5x256xf32>
    %437 = arith.addf %433, %436 : vector<5x256xf32>
    %cst_195 = arith.constant 5.000000e-01 : f32
    %438 = vector.broadcast %cst_195 : f32 to vector<5x256xf32>
    %439 = arith.mulf %438, %437 : vector<5x256xf32>
    %cst_196 = arith.constant 2.000000e+00 : f32
    %440 = math.sqrt %cst_196 : f32
    %cst_197 = arith.constant 1.000000e+00 : f32
    %441 = arith.divf %cst_197, %440 : f32
    %442 = vector.broadcast %441 : f32 to vector<5x256xf32>
    %443 = arith.mulf %437, %442 : vector<5x256xf32>
    %444 = math.erf %443 : vector<5x256xf32>
    %cst_198 = arith.constant 1.000000e+00 : f32
    %445 = vector.broadcast %cst_198 : f32 to vector<5x256xf32>
    %446 = arith.addf %445, %444 : vector<5x256xf32>
    %447 = arith.mulf %439, %446 : vector<5x256xf32>
    %448 = arith.truncf %447 : vector<5x256xf32> to vector<5x256xbf16>
    %c1_199 = arith.constant 1 : index
    %c0_200 = arith.constant 0 : index
    %c0_201 = arith.constant 0 : index
    %449 = vector.load %arg8[%c1_199, %c0_200, %c0_201] : memref<2x256x64xbf16, #tpu.memory_space<vmem>>, vector<1x256x64xbf16>
    %450 = vector.shape_cast %449 : vector<1x256x64xbf16> to vector<256x64xbf16>
    %cst_202 = arith.constant dense<0.000000e+00> : vector<5x64xf32>
    %451 = tpu.matmul %448, %450, %cst_202 {dimension_numbers = #tpu.dot_dimension_numbers<[1], [0], [0], [1], [0, 0, 1, 1], [], []>} : vector<5x256xbf16>, vector<256x64xbf16>, vector<5x64xf32> -> vector<5x64xf32>
    %452 = vector.broadcast %248 : vector<1x64xf32> to vector<5x64xf32>
    %453 = arith.addf %451, %452 : vector<5x64xf32>
    %454 = arith.addf %453, %407 : vector<5x64xf32>
    %455 = vector.extract_strided_slice %454 {offsets = [0, 0], sizes = [1, 64], strides = [1, 1]} : vector<5x64xf32> to vector<1x64xf32>
    %c0_203 = arith.constant 0 : index
    %c0_204 = arith.constant 0 : index
    %456 = vector.load %arg9[%c0_203, %c0_204] : memref<2x64xf32, #tpu.memory_space<vmem>>, vector<1x64xf32>
    %c1_205 = arith.constant 1 : index
    %c0_206 = arith.constant 0 : index
    %457 = vector.load %arg9[%c1_205, %c0_206] : memref<2x64xf32, #tpu.memory_space<vmem>>, vector<1x64xf32>
    %cst_207 = arith.constant dense<0.000000e+00> : vector<1xf32>
    %458 = vector.multi_reduction <add>, %455, %cst_207 [1] : vector<1x64xf32> to vector<1xf32>
    %459 = vector.shape_cast %458 : vector<1xf32> to vector<1x1xf32>
    %cst_208 = arith.constant 6.400000e+01 : f32
    %460 = vector.broadcast %cst_208 : f32 to vector<1x1xf32>
    %461 = arith.divf %459, %460 : vector<1x1xf32>
    %462 = vector.broadcast %461 : vector<1x1xf32> to vector<1x64xf32>
    %463 = arith.subf %455, %462 : vector<1x64xf32>
    %464 = arith.mulf %463, %463 : vector<1x64xf32>
    %cst_209 = arith.constant dense<0.000000e+00> : vector<1xf32>
    %465 = vector.multi_reduction <add>, %464, %cst_209 [1] : vector<1x64xf32> to vector<1xf32>
    %466 = vector.shape_cast %465 : vector<1xf32> to vector<1x1xf32>
    %cst_210 = arith.constant 6.400000e+01 : f32
    %467 = vector.broadcast %cst_210 : f32 to vector<1x1xf32>
    %468 = arith.divf %466, %467 : vector<1x1xf32>
    %469 = vector.broadcast %461 : vector<1x1xf32> to vector<1x64xf32>
    %470 = arith.subf %455, %469 : vector<1x64xf32>
    %cst_211 = arith.constant 9.99999997E-7 : f32
    %471 = vector.broadcast %cst_211 : f32 to vector<1x1xf32>
    %472 = arith.addf %468, %471 : vector<1x1xf32>
    %473 = math.rsqrt %472 : vector<1x1xf32>
    %474 = vector.broadcast %473 : vector<1x1xf32> to vector<1x64xf32>
    %475 = arith.mulf %470, %474 : vector<1x64xf32>
    %476 = arith.mulf %475, %456 : vector<1x64xf32>
    %477 = arith.addf %476, %457 : vector<1x64xf32>
    %478 = arith.mulf %477, %477 : vector<1x64xf32>
    %cst_212 = arith.constant dense<0.000000e+00> : vector<1xf32>
    %479 = vector.multi_reduction <add>, %478, %cst_212 [1] : vector<1x64xf32> to vector<1xf32>
    %480 = vector.shape_cast %479 : vector<1xf32> to vector<1x1xf32>
    %481 = math.sqrt %480 : vector<1x1xf32>
    %cst_213 = arith.constant 9.99999996E-13 : f32
    %482 = vector.broadcast %cst_213 : f32 to vector<1x1xf32>
    %483 = arith.maximumf %481, %482 : vector<1x1xf32>
    %484 = vector.broadcast %483 : vector<1x1xf32> to vector<1x64xf32>
    %485 = arith.divf %477, %484 : vector<1x64xf32>
    %c0_214 = arith.constant 0 : index
    %c0_215 = arith.constant 0 : index
    %c0_216 = arith.constant 0 : index
    %486 = vector.load %arg10[%c0_214, %c0_215, %c0_216] : memref<1x1x64xf32, #tpu.memory_space<vmem>>, vector<1x1x64xf32>
    %487 = vector.shape_cast %486 : vector<1x1x64xf32> to vector<1x64xf32>
    %488 = vector.shape_cast %485 : vector<1x64xf32> to vector<1x1x64xf32>
    tpu.vector_store %arg10[%c0_214, %c0_215, %c0_216], %488 {strides = array<i32>} : memref<1x1x64xf32, #tpu.memory_space<vmem>>, vector<1x1x64xf32>,
    return
  }
  func.func @transform_0(%arg0: i32) -> (i32, i32, i32) {
    %c0_i32 = arith.constant 0 : i32
    %c0_i32_0 = arith.constant 0 : i32
    %c0_i32_1 = arith.constant 0 : i32
    return %arg0, %c0_i32, %c0_i32_0 : i32, i32, i32
  }
  func.func @transform_1(%arg0: i32) -> (i32, i32) {
    %c0_i32 = arith.constant 0 : i32
    %c0_i32_0 = arith.constant 0 : i32
    %c0_i32_1 = arith.constant 0 : i32
    return %c0_i32, %c0_i32_0 : i32, i32
  }
  func.func @transform_2(%arg0: i32) -> (i32, i32) {
    %c0_i32 = arith.constant 0 : i32
    %c0_i32_0 = arith.constant 0 : i32
    %c0_i32_1 = arith.constant 0 : i32
    return %c0_i32, %c0_i32_0 : i32, i32
  }
  func.func @transform_3(%arg0: i32) -> (i32, i32, i32, i32) {
    %c0_i32 = arith.constant 0 : i32
    %c0_i32_0 = arith.constant 0 : i32
    %c0_i32_1 = arith.constant 0 : i32
    %c0_i32_2 = arith.constant 0 : i32
    %c0_i32_3 = arith.constant 0 : i32
    return %c0_i32, %c0_i32_0, %c0_i32_1, %c0_i32_2 : i32, i32, i32, i32
  }
  func.func @transform_4(%arg0: i32) -> (i32, i32, i32) {
    %c0_i32 = arith.constant 0 : i32
    %c0_i32_0 = arith.constant 0 : i32
    %c0_i32_1 = arith.constant 0 : i32
    %c0_i32_2 = arith.constant 0 : i32
    return %c0_i32, %c0_i32_0, %c0_i32_1 : i32, i32, i32
  }
  func.func @transform_5(%arg0: i32) -> (i32, i32, i32) {
    %c0_i32 = arith.constant 0 : i32
    %c0_i32_0 = arith.constant 0 : i32
    %c0_i32_1 = arith.constant 0 : i32
    %c0_i32_2 = arith.constant 0 : i32
    return %c0_i32, %c0_i32_0, %c0_i32_1 : i32, i32, i32
  }
  func.func @transform_6(%arg0: i32) -> (i32, i32, i32) {
    %c0_i32 = arith.constant 0 : i32
    %c0_i32_0 = arith.constant 0 : i32
    %c0_i32_1 = arith.constant 0 : i32
    %c0_i32_2 = arith.constant 0 : i32
    return %c0_i32, %c0_i32_0, %c0_i32_1 : i32, i32, i32
  }
  func.func @transform_7(%arg0: i32) -> (i32, i32, i32) {
    %c0_i32 = arith.constant 0 : i32
    %c0_i32_0 = arith.constant 0 : i32
    %c0_i32_1 = arith.constant 0 : i32
    %c0_i32_2 = arith.constant 0 : i32
    return %c0_i32, %c0_i32_0, %c0_i32_1 : i32, i32, i32
  }
  func.func @transform_8(%arg0: i32) -> (i32, i32) {
    %c0_i32 = arith.constant 0 : i32
    %c0_i32_0 = arith.constant 0 : i32
    %c0_i32_1 = arith.constant 0 : i32
    return %c0_i32, %c0_i32_0 : i32, i32
  }
  func.func @transform_9(%arg0: i32) -> (i32, i32, i32) {
    %c0_i32 = arith.constant 0 : i32
    %c0_i32_0 = arith.constant 0 : i32
    %c0_i32_1 = arith.constant 0 : i32
    return %arg0, %c0_i32, %c0_i32_0 : i32, i32, i32
  }
}

</mosaic_0001>

<bundles_post_ra>
// kernel: endovit_encoder_forward.1
= control target key start
LH: loop header
LB: loop body
LE: loop exit
PB: predicated region body
PF: predicated region fallthrough
CT: control target
= control target key end

     0   :  { %14 = vsyncpa [#allocation3], 0  ;;  %s5047_s0 = inlined_call_operand.vmem [shape: bf16[2,5,768], index: 0, kind: input, shape index: {}]   ;;  %s5048_s1 = inlined_call_operand.vmem [shape: bf16[768,64], index: 1, kind: input, shape index: {}]   ;;  %s5049_s2 = inlined_call_operand.vmem [shape: f32[5,64], index: 2, kind: input, shape index: {}]   ;;  %s5050_s3 = inlined_call_operand.vmem [shape: bf16[2,4,64,64], index: 3, kind: input, shape index: {}]   ;;  %s5051_s4 = inlined_call_operand.vmem [shape: f32[2,9,64], index: 4, kind: input, shape index: {}]   ;;  %s5052_s5 = inlined_call_operand.vmem [shape: bf16[2,64,256], index: 5, kind: input, shape index: {}]   ;;  %s5053_s6 = inlined_call_operand.vmem [shape: f32[2,1,256], index: 6, kind: input, shape index: {}]   ;;  %s5054_s7 = inlined_call_operand.vmem [shape: bf16[2,256,64], index: 7, kind: input, shape index: {}]   ;;  %s5055_s8 = inlined_call_operand.vmem [shape: f32[2,64], index: 8, kind: input, shape index: {}]   ;;  %s5056_s9 = inlined_call_operand.hbm [shape: f32[2,1,64], index: 9, kind: output, shape index: {}]  }
   0x1   :  { %16 = vsyncpa [#allocation3 + $0x1], 0  ;;  %s4220_s30 = smov 0   ;;  %s4222_s10 = smov 0  }
   0x2   :  { %s4224_s11 = smov 0   ;;  %s4226_s12 = smov 0  }
   0x3 LB: > { %s4241_s13 = sadd.s32 4294967295, %s4163_s12   ;;  %s3171_s14 = sadd.s32 4294967294, %s4163_s12   ;;  %s4163_s12 = sphi %s4226_s12, %s5068_s12   ;;  %s4159_s11 = sphi %s4224_s11, %s5067_s11   ;;  %s4155_s10 = sphi %s4222_s10, %s5066_s10   ;;  %s4151_s30 = sphi %s4220_s30, %s5065_s30  }
   0x4   : > { %s4245_s15 = sadd.s32 1, %s4163_s12   ;;  %s223_s16 = sadd.s32 1, %s4159_s11 }
   0x5   : > { %s220_s17 = ssub.s32 %s4163_s12, %s4245_s15  ;;  %p233_p0 = scmp.ne.s32.totalorder %s4159_s11, %s4155_s10 }
   0x6   : > { %p221_p1 = scmp.eq.s32.totalorder %s220_s17, 0  ;;  %p234_p2 = scmp.eq.s32.totalorder %s4241_s13, 1 }
   0x7   : > { %p239_p3 = scmp.ne.s32.totalorder %s4155_s10, %s4151_s30  ;;  %p240_p4 = scmp.eq.s32.totalorder %s3171_s14, 1 }
   0x8   : > { %s4256_s18 = scalar_select %p221_p1, %s4159_s11, %s223_s16  }
   0x9   : > { %p4258_p5 = por %p234_p2, %p233_p0  ;;  %p4262_p6 = por %p240_p4, %p239_p3 }
   0xa   : > { %p3174_p7 = scmp.ge.s32.totalorder %s4163_s12, 1  ;;  %p290_p8 = scmp.lt.s32.totalorder %s4163_s12, 3 }
   0xc   : > { %p291_p9 = pnand %p3174_p7, %p290_p8 }
   0xd   : > { %v3905_v0 = vld [vmem:[%s5048_s1 + $0x40] sm:$0xff] (!%p291_p9)   ;;  %v3909_v4 = vld [vmem:[%s5048_s1 + $0x48] sm:$0xff] (!%p291_p9)   ;;  %v3913_v8 = vld [vmem:[%s5048_s1 + $0x50] sm:$0xff] (!%p291_p9)   ;;  %p325_p10 = scmp.lt.s32.totalorder (!%p291_p9), %s4241_s13, 1  ;;  %vm871_vm0 = vcmask (!%p291_p9), 520192   ;;  %vm4166_vm1 = vmmov (!%p291_p9), 0  }
   0xe   : > { %294 = sbr.rel (%p291_p9) target bundleno = 5435 (0x153b), region = 56  ;;  %v3906_v1 = vld [vmem:[%s5048_s1] sm:$0xff] (!%p291_p9)   ;;  %3463 = vmatprep.subr.bf16.mxu0 (!%p291_p9), %v3905_v0  ;;  %v3910_v5 = vld [vmem:[%s5048_s1 + $0x8] sm:$0xff] (!%p291_p9)   ;;  %v3914_v9 = vld [vmem:[%s5048_s1 + $0x10] sm:$0xff] (!%p291_p9)   ;;  %vm933_vm2 = vcmask (!%p291_p9), 523264   ;;  %vm1268_vm9 = vcmask (!%p291_p9), 1041408  }
   0xf   : > { %v3907_v2 = vld [vmem:[%s5048_s1 + $0xc0] sm:$0xff] (!%p291_p9)   ;;  %3464 = vmatpush3.bf16.msra.mxu0 (!%p291_p9), %v3906_v1  ;;  %v3911_v6 = vld [vmem:[%s5048_s1 + $0xc8] sm:$0xff] (!%p291_p9)   ;;  %v3915_v10 = vld [vmem:[%s5048_s1 + $0xd0] sm:$0xff] (!%p291_p9)   ;;  %vm1269_vm11 = vcmask (!%p291_p9), 1042432   ;;  %vm1187_vm15 = vcmask (!%p291_p9), 36864   ;;  %s323_s16 = sand.u32 (!%p291_p9), 1, %s4155_s10  }
  0x10   : > { %v3908_v3 = vld [vmem:[%s5048_s1 + $0x80] sm:$0xff] (!%p291_p9)   ;;  %3485 = vmatprep.subr.bf16.mxu1 (!%p291_p9), %v3907_v2  ;;  %3465 = vmatprep.subr.bf16.mxu0 (!%p291_p9), %v3909_v4  ;;  %v3912_v7 = vld [vmem:[%s5048_s1 + $0x88] sm:$0xff] (!%p291_p9)   ;;  %v3916_v11 = vld [vmem:[%s5048_s1 + $0x90] sm:$0xff] (!%p291_p9)   ;;  %s3460_s17 = sshll.u32 (!%p291_p9), %s4241_s13, 4  ;;  %s324_s21 = scalar_lea.vmem (!%p291_p9), [#allocation2], %s323_s16 }
  0x11   : > { %3486 = vmatpush3.bf16.msra.mxu1 (!%p291_p9), %v3908_v3  ;;  %v3917_v12 = vld [vmem:[%s5048_s1 + $0x58] sm:$0xff] (!%p291_p9)   ;;  %v3921_v16 = vld [vmem:[%s5048_s1 + $0x60] sm:$0xff] (!%p291_p9)   ;;  %v3925_v20 = vld [vmem:[%s5048_s1 + $0x68] sm:$0xff] (!%p291_p9)   ;;  %s5004_s26 = scalar_lea.hbm (!%p291_p9), %s5056_s9, %s3460_s17  ;;  %s3104_s28 = scalar_lea.sflag (!%p291_p9), [#allocation3], %s323_s16 }
  0x12   : > { %3487 = vmatprep.subr.bf16.mxu1 (!%p291_p9), %v3911_v6  ;;  %v3918_v13 = vld [vmem:[%s5048_s1 + $0x18] sm:$0xff] (!%p291_p9)   ;;  %v3922_v17 = vld [vmem:[%s5048_s1 + $0x20] sm:$0xff] (!%p291_p9)   ;;  %v3926_v21 = vld [vmem:[%s5048_s1 + $0x28] sm:$0xff] (!%p291_p9)  }
  0x13   : > { %3466 = vmatpush3.bf16.msra.mxu0 (!%p291_p9), %v3910_v5  ;;  %v3919_v14 = vld [vmem:[%s5048_s1 + $0xd8] sm:$0xff] (!%p291_p9)   ;;  %v3923_v18 = vld [vmem:[%s5048_s1 + $0xe0] sm:$0xff] (!%p291_p9)   ;;  %v3927_v22 = vld [vmem:[%s5048_s1 + $0xe8] sm:$0xff] (!%p291_p9)  }
  0x14   : > { %3467 = vmatprep.subr.bf16.mxu0 (!%p291_p9), %v3913_v8  ;;  %v3920_v15 = vld [vmem:[%s5048_s1 + $0x98] sm:$0xff] (!%p291_p9)   ;;  %v3924_v19 = vld [vmem:[%s5048_s1 + $0xa0] sm:$0xff] (!%p291_p9)   ;;  %v3928_v23 = vld [vmem:[%s5048_s1 + $0xa8] sm:$0xff] (!%p291_p9)  }
  0x15   : > { %3488 = vmatpush3.bf16.msra.mxu1 %v3912_v7  ;;  %s326_s27 = scalar_select %p325_p10, %s4241_s13, 1  ;;  %v3929_v24 = vld [vmem:[%s5048_s1 + $0x70] sm:$0xff]   ;;  %v3933_v28 = vld [vmem:[%s5048_s1 + $0x78] sm:$0xff]   ;;  %v3939_v35 = vld [vmem:[%s5048_s1 + $0x140] sm:$0xff]  }
  0x16   : > { %3489 = vmatprep.subr.bf16.mxu1 %v3915_v10  ;;  %v3930_v25 = vld [vmem:[%s5048_s1 + $0x30] sm:$0xff]   ;;  %v3934_v29 = vld [vmem:[%s5048_s1 + $0x38] sm:$0xff]   ;;  %v3942_v39 = vld [vmem:[%s5048_s1 + $0x100] sm:$0xff]   ;;  %s4169_s13 = smov [#allocation2]  }
  0x17   : > { %3468 = vmatpush3.bf16.msra.mxu0 %v3914_v9  ;;  %s3861_s24 = smul.u32 24, %s326_s27  ;;  %v3931_v26 = vld [vmem:[%s5048_s1 + $0xf0] sm:$0xff]   ;;  %v3935_v30 = vld [vmem:[%s5048_s1 + $0xf8] sm:$0xff]   ;;  %v3943_v40 = vld [vmem:[%s5048_s1 + $0x148] sm:$0xff]   ;;  %s3116_s27 = sshll.u32 %s324_s21, 4  ;;  %s5006_s27 = int_to_ptr.vmem [resolvable:$true] %s3116_s27 }
  0x18   : > { %3469 = vmatprep.subr.bf16.mxu0 %v3917_v12  ;;  %v3932_v27 = vld [vmem:[%s5048_s1 + $0xb0] sm:$0xff]   ;;  %v3938_v34 = vld [vmem:[%s5048_s1 + $0xb8] sm:$0xff]   ;;  %v3944_v41 = vld [vmem:[%s5048_s1 + $0x108] sm:$0xff]   ;;  %s4105_s29 = sshll.u32 %s4169_s13, 4  ;;  %s4106_s29 = int_to_ptr.vmem [resolvable:$false] %s4105_s29 }
  0x19   : > { %3490 = vmatpush3.bf16.msra.mxu1 %v3916_v11  ;;  %s4360_s23 = scalar_lea.vmem %s5047_s0, %s3861_s24  ;;  %v3945_v42 = vld [vmem:[%s5048_s1 + $0x150] sm:$0xff]   ;;  %v3947_v44 = vld [vmem:[%s5048_s1 + $0x158] sm:$0xff]   ;;  %v3949_v46 = vld [vmem:[%s5048_s1 + $0x160] sm:$0xff]   ;;  %s4107_s14 = scalar_lea.vmem %s4106_s29, 32 }
  0x1a   : > { %3491 = vmatprep.subr.bf16.mxu1 %v3919_v14  ;;  %v331_v31 = vld [vmem:[%s4360_s23] sm:$0x77]  ;;  %v332_v36 = vld [vmem:[%s4360_s23 + $0x8] sm:$0x77]  ;;  %v3946_v43 = vld [vmem:[%s5048_s1 + $0x110] sm:$0xff]   ;;  %p4108_p0 = scmp.lt.s32.totalorder %s5006_s27, %s4106_s29 }
  0x1b   : > { %3470 = vmatpush3.bf16.msra.mxu0 %v3918_v13  ;;  %v3176_v32 = vcombine.low %v331_v31, %v331_v31  ;;  %v3177_v33 = vcombine.high %v331_v31, %v331_v31  ;;  %v3178_v37 = vcombine.low %v332_v36, %v332_v36  ;;  %v3179_v38 = vcombine.high %v332_v36, %v332_v36  ;;  %v3948_v45 = vld [vmem:[%s5048_s1 + $0x118] sm:$0xff]   ;;  %v3950_v47 = vld [vmem:[%s5048_s1 + $0x120] sm:$0xff]   ;;  %v3951_v48 = vld [vmem:[%s5048_s1 + $0x168] sm:$0xff]  }
  0x1c   : > { %3471 = vmatprep.subr.bf16.mxu0 %v3921_v16  ;;  %v333_v49 = vld [vmem:[%s4360_s23 + $0x10] sm:$0x77]  ;;  %v3952_v51 = vld [vmem:[%s5048_s1 + $0x128] sm:$0xff]   ;;  %v3955_v54 = vld [vmem:[%s5048_s1 + $0x178] sm:$0xff]   ;;  %s4101_s23 = scalar_lea.vmem %s5006_s27, 16 }
  0x1d   : > { %3492 = vmatpush3.bf16.msra.mxu1 %v3920_v15  ;;  %772 = vmatprep.mubr.bf16.mxu0 %v3177_v33  ;;  %v3181_v50 = vcombine.high %v333_v49, %v333_v49  ;;  %v3953_v52 = vld [vmem:[%s5048_s1 + $0x170] sm:$0xff]   ;;  %v3956_v55 = vld [vmem:[%s5048_s1 + $0x138] sm:$0xff]   ;;  %v3180_v56 = vcombine.low %v333_v49, %v333_v49  ;;  %v430_v58 = vld [vmem:[%s5049_s2] sm:$0x1f]  ;;  %v860_v49 = vlaneseq  ;;  %p4102_p11 = scmp.ne.s32.totalorder %s5006_s27, %s4101_s23  ;;  %p4109_p1 = scmp.lt.s32.totalorder %s4107_s14, %s4101_s23 }
  0x1e   : > { %3493 = vmatprep.subr.bf16.mxu1 %v3923_v18  ;;  %812 = vmatprep.mubr.bf16.mxu1 %v3179_v38  ;;  %v3954_v53 = vld [vmem:[%s5048_s1 + $0x130] sm:$0xff]   ;;  %v3959_v18 = vld [vmem:[%s5050_s3] sm:$0xff]   ;;  %v3968_v38 = vld [vmem:[%s5050_s3 + $0x28] sm:$0xff]  }
  0x1f   : > { %3472 = vmatpush3.bf16.msra.mxu0 %v3922_v17  ;;  %v3230_v31 = vld [vmem:[%s5051_s4] ss:$0 sm:$0xff]  ;;  %v3231_v33 = vld [vmem:[%s5051_s4 + $0x1] ss:$0 sm:$0xff]  ;;  %p4103_p12 = pnand %p4102_p11, %p4258_p5  ;;  %p4110_p2 = por %p4109_p1, %p4108_p0 }
  0x20   : > { %3473 = vmatprep.subr.bf16.mxu0 %v3925_v20  ;;  %v3960_v20 = vld [vmem:[%s5050_s3 + $0x40] sm:$0xff]  }
  0x21   : > { %3494 = vmatpush3.bf16.msra.mxu1 %v3924_v19  ;;  %v4165_v19 = vmov 0.0   ;;  %v3967_v36 = vld [vmem:[%s5050_s3 + $0x20] sm:$0xff]   ;;  %p4104_p13 = pneg %p4103_p12 }
  0x22   : > { %3495 = vmatprep.subr.bf16.mxu1 %v3927_v22  ;;  %v3962_v22 = vld [vmem:[%s5050_s3 + $0x48] sm:$0xff]  }
  0x23   : > { %3474 = vmatpush3.bf16.msra.mxu0 %v3926_v21  ;;  %v3961_v21 = vld [vmem:[%s5050_s3 + $0x8] sm:$0xff]   ;;  %p4111_p3 = pnand %p4110_p2, %p4104_p13 }
  0x24   : > { %3475 = vmatprep.subr.bf16.mxu0 %v3929_v24  ;;  %v3964_v24 = vld [vmem:[%s5050_s3 + $0x50] sm:$0xff]  }
  0x25   : > { %3496 = vmatpush3.bf16.msra.mxu1 %v3928_v23  ;;  %v3963_v23 = vld [vmem:[%s5050_s3 + $0x10] sm:$0xff]  }
  0x26   : > { %3497 = vmatprep.subr.bf16.mxu1 %v3931_v26  ;;  %v3966_v26 = vld [vmem:[%s5050_s3 + $0x58] sm:$0xff]  }
  0x27   : > { %3476 = vmatpush3.bf16.msra.mxu0 %v3930_v25  ;;  %v3965_v25 = vld [vmem:[%s5050_s3 + $0x18] sm:$0xff]  }
  0x28   : > { %3477 = vmatprep.subr.bf16.mxu0 %v3933_v28 }
  0x29   : > { %3498 = vmatpush3.bf16.msra.mxu1 %v3932_v27 }
  0x2a   : > { %3499 = vmatprep.subr.bf16.mxu1 %v3935_v30 }
  0x2b   : > { %3478 = vmatpush3.bf16.msra.mxu0 %v3934_v29 }
  0x2c   : > { %3507 = vmatprep.subr.bf16.mxu0 %v3939_v35 }
  0x2d   : > { %3500 = vmatpush3.bf16.msra.mxu1 %v3938_v34 }
  0x2e   : > { %773 = vmatmul.mubr.bf16.vlgmr.msra.gmra.mrb[0].mxu0 %v3176_v32  ;;  %3645 = vmatprep.subr.bf16.mxu1 %v4165_v19 }
  0x2f   : > { %3508 = vmatpush3.bf16.msra.mxu0 %v3942_v39  ;;  %852 = vmatprep.mubr.bf16.mxu0 %v3181_v50  ;;  %v3969_v39 = vld [vmem:[%s5050_s3 + $0x30] sm:$0xff]   ;;  %v4501_v50 = vand.u32 127, %v860_v49 }
  0x30   : > { %813 = vmatmul.mubr.bf16.vlgmr.msra.gmra.mrb[0].mxu1 %v3178_v37  ;;  %3509 = vmatprep.subr.bf16.mxu0 %v3943_v40  ;;  %v3970_v40 = vld [vmem:[%s5050_s3 + $0x38] sm:$0xff]  }
  0x31   : > { %3646 = vmatpush3.bf16.msra.mxu1 %v3959_v18  ;;  %3653 = vmatprep.mubr.msk.bf16.mxu1 %vm4166_vm1, %v4165_v19  ;;  %vm1200_vm3 = vcmp.ge.s32.totalorder %v4501_v50, 16  ;;  %vm1201_vm4 = vcmp.lt.s32.totalorder %v4501_v50, 32  ;;  %vm1133_vm5 = vcmp.lt.s32.totalorder %v4501_v50, 16  ;;  %vm1361_vm7 = vcmp.ge.s32.totalorder %v4501_v50, 32 }
  0x32   : > { %3647 = vmatprep.subr.bf16.mxu1 %v4165_v19  ;;  %vm4514_vm6 = vmand %vm1200_vm3, %vm1201_vm4  ;;  %vm1362_vm8 = vcmp.lt.s32.totalorder %v4501_v50, 48  ;;  %vm1472_vm12 = vcmp.ge.s32.totalorder %v4501_v50, 48  ;;  %vm1473_vm13 = vcmp.lt.s32.totalorder %v4501_v50, 64  ;;  %vm1264_vm3 = vcmask 39936  }
  0x33   : > { %3510 = vmatpush3.bf16.msra.mxu0 %v3944_v41  ;;  %vm4530_vm10 = vmand %vm1361_vm7, %vm1362_vm8 }
  0x34   : > { %3511 = vmatprep.subr.bf16.mxu0 %v3945_v42  ;;  %vm4545_vm14 = vmand %vm1472_vm12, %vm1473_vm13 }
  0x35   : > { %3648 = vmatpush3.bf16.msra.mxu1 %v3961_v21 }
  0x36   : > { %3649 = vmatprep.subr.bf16.mxu1 %v4165_v19 }
  0x37   : > { %3512 = vmatpush3.bf16.msra.mxu0 %v3946_v43 }
  0x38   : > { %3513 = vmatprep.subr.bf16.mxu0 %v3947_v44 }
  0x39   : > { %3650 = vmatpush3.bf16.msra.mxu1 %v3963_v23 }
  0x3a   : > { %3651 = vmatprep.subr.bf16.mxu1 %v4165_v19 }
  0x3b   : > { %3514 = vmatpush3.bf16.msra.mxu0 %v3948_v45 }
  0x3c   : > { %3515 = vmatprep.subr.bf16.mxu0 %v3949_v46 }
  0x3d   : > { %3652 = vmatpush3.bf16.msra.mxu1 %v3965_v25 }
  0x3e   : > { %3657 = vmatprep.subr.bf16.mxu1 %v4165_v19 }
  0x3f   : > { %3516 = vmatpush3.bf16.msra.mxu0 %v3950_v47 }
  0x40   : > { %3517 = vmatprep.subr.bf16.mxu0 %v3951_v48 }
  0x43   : > { %3518 = vmatpush3.bf16.msra.mxu0 %v3952_v51  ;;  %v3246_v51 = vld [vmem:[%s5051_s4 + $0x3] ss:$0 sm:$0xff] }
  0x44   : > { %3519 = vmatprep.subr.bf16.mxu0 %v3953_v52  ;;  %v3260_v52 = vld [vmem:[%s5051_s4 + $0x4] ss:$0 sm:$0xff] }
  0x47   : > { %3520 = vmatpush3.bf16.msra.mxu0 %v3954_v53 }
  0x48   : > { %3521 = vmatprep.subr.bf16.mxu0 %v3955_v54 }
  0x4b   : > { %3522 = vmatpush3.bf16.msra.mxu0 %v3956_v55 }
  0x4c   : > { %3669 = vmatprep.subr.bf16.mxu0 %v4165_v19 }
  0x4e   : > { %853 = vmatmul.mubr.bf16.vlgmr.msra.gmra.mrb[4].mxu0 %v3180_v56 }
  0x4f   : > { %3670 = vmatpush3.bf16.msra.mxu0 %v3960_v20  ;;  %3677 = vmatprep.mubr.msk.bf16.mxu0 %vm4166_vm1, %v4165_v19 }
  0x50   : > { %3671 = vmatprep.subr.bf16.mxu0 %v4165_v19 }
  0x53   : > { %3672 = vmatpush3.bf16.msra.mxu0 %v3962_v22 }
  0x54   : > { %3673 = vmatprep.subr.bf16.mxu0 %v4165_v19 }
  0x57   : > { %3674 = vmatpush3.bf16.msra.mxu0 %v3964_v24 }
  0x58   : > { %3675 = vmatprep.subr.bf16.mxu0 %v4165_v19 }
  0x5b   : > { %3676 = vmatpush3.bf16.msra.mxu0 %v3966_v26 }
  0x5c   : > { %3681 = vmatprep.subr.bf16.mxu0 %v4165_v19 }
 0x101   : > { %v3479_v57 = vpop.f32.mrb[0].mxu0 }
 0x102   : > { %v3480_v59 = vpop.f32.mrb[1].mxu0 }
 0x103   : > { %v3481_v60 = vadd.f32 %v3480_v59, %v3479_v57  ;;  %v3482_v61 = vpop.f32.mrb[2].mxu0  ;;  %v3501_v62 = vpop.f32.mrb[0].mxu1 }
 0x104   : > { %v3483_v63 = vpop.f32.mrb[3].mxu0  ;;  %v3502_v0 = vpop.f32.mrb[1].mxu1 }
 0x105   : > { %v775_v1 = vadd.f32 %v3481_v60, %v430_v58  ;;  %v3503_v2 = vadd.f32 %v3502_v0, %v3501_v62  ;;  %v3504_v3 = vpop.f32.mrb[2].mxu1  ;;  %v3232_v0 = vld [vmem:[%s5051_s4 + $0x2] ss:$0 sm:$0xff] }
 0x106   : > { %v3505_v4 = vpop.f32.mrb[3].mxu1 }
 0x107   : > { %v815_v5 = vadd.f32 %v3503_v2, %v775_v1 }
 0x121   : > { %v3523_v6 = vpop.f32.mrb[4].mxu0 }
 0x122   : > { %v3524_v7 = vpop.f32.mrb[5].mxu0 }
 0x123   : > { %v3525_v8 = vadd.f32 %v3524_v7, %v3523_v6  ;;  %v3526_v9 = vpop.f32.mrb[6].mxu0 }
 0x124   : > { %v3527_v10 = vpop.f32.mrb[7].mxu0 }
 0x125   : > { %v4425_v11 = vadd.f32 %v3525_v8, %v815_v5  ;;  %v4167_v5 = vmov 65535  }
 0x126   : > { %v1270_v6 = vsel %vm1268_vm9, 4294967295, %v4167_v5 }
 0x127   : > { %v872_v12 = vsel %vm871_vm0, %v4425_v11, 0.0  ;;  %v4540_v10 = vsel %vm1269_vm11, %v1270_v6, 0 }
 0x128   : > { %873 = vadd.xlane.f32.xlu0 %v872_v12 }
 0x1b5   : > { %v874_v13 = vpop.xlane.xlu0 %873 }
 0x1b6   : > { %v876_v14 = vmul.f32 0.015625, %v874_v13 }
 0x1b8   : > { %v877_v15 = vsub.f32 %v4425_v11, %v876_v14 }
 0x1ba   : > { %v878_v16 = vmul.f32 %v877_v15, %v877_v15 }
 0x1bc   : > { %v879_v17 = vsel %vm871_vm0, %v878_v16, 0.0 }
 0x1bd   : > { %880 = vadd.xlane.f32.xlu0 %v879_v17 }
 0x24a   : > { %v881_v27 = vpop.xlane.xlu0 %880 }
 0x24b   : > { %v882_v28 = vmul.f32 0.015625, %v881_v27 }
 0x24d   : > { %v883_v29 = vadd.f32 1e-06, %v882_v28 }
 0x24f   : > { %4047 = vrsqrt.f32 %v883_v29 }
 0x259   : > { %v4048_v30 = vpop.eup %4047 }
 0x25a   : > { %v885_v32 = vmul.f32 %v4048_v30, %v877_v15  ;;  %v4018_v15 = vld [vmem:[%s5050_s3 + $0xf8] sm:$0xff]  }
 0x25c   : > { %v890_v34 = vmul.f32 %v3230_v31, %v885_v32 }
 0x25e   : > { %v895_v35 = vadd.f32 %v3231_v33, %v890_v34 }
 0x260   : > { %v896_v37 = vpack.c.bf16 %v895_v35, %v895_v35 }
 0x262   : > { %3654 = vmatmul.mubr.msk.bf16.vlgmr.msra.gmra.mrb[4].mxu1 %vm933_vm2, %v896_v37  ;;  %3678 = vmatmul.mubr.msk.bf16.vlgmr.msra.gmra.mrb[8].mxu0 %vm933_vm2, %v896_v37 }
 0x263   : > { %3658 = vmatpush3.bf16.msra.mxu1 %v3967_v36  ;;  %3665 = vmatprep.mubr.msk.bf16.mxu1 %vm4166_vm1, %v4165_v19 }
 0x264   : > { %3659 = vmatprep.subr.bf16.mxu1 %v4165_v19  ;;  %3683 = vmatprep.mubr.msk.bf16.mxu0 %vm4166_vm1, %v4165_v19 }
 0x267   : > { %3660 = vmatpush3.bf16.msra.mxu1 %v3968_v38 }
 0x268   : > { %3661 = vmatprep.subr.bf16.mxu1 %v4165_v19 }
 0x26b   : > { %3662 = vmatpush3.bf16.msra.mxu1 %v3969_v39 }
 0x26c   : > { %3663 = vmatprep.subr.bf16.mxu1 %v4165_v19 }
 0x26f   : > { %3664 = vmatpush3.bf16.msra.mxu1 %v3970_v40 }
 0x270   : > { %3687 = vmatprep.subr.bf16.mxu1 %v4165_v19 }
 0x272   : > { %3666 = vmatmul.mubr.msk.bf16.vlgmr.msra.gmra.mrb[8].mxu1 %vm933_vm2, %v896_v37 }
 0x273   : > { %3689 = vmatprep.mubr.msk.bf16.mxu1 %vm4166_vm1, %v4165_v19 }
 0x335   : > { %v971_v41 = vpop.f32.mrb[4].mxu1  ;;  %v1125_v42 = vpop.f32.mrb[8].mxu0 }
 0x336   : > { %v3655_v43 = vpop.f32.mrb[5].mxu1  ;;  %v3679_v44 = vpop.f32.mrb[9].mxu0  ;;  %v4511_v56 = vadd.f32 %v3260_v52, %v1125_v42  ;;  %v972_v8 = vadd.f32 %v3232_v0, %v971_v41 }
 0x337   : > { %v974_v45 = vpop.f32.mrb[6].mxu1  ;;  %v1128_v46 = vpop.f32.mrb[10].mxu0 }
 0x338   : > { %v3656_v47 = vpop.f32.mrb[7].mxu1  ;;  %v3680_v48 = vpop.f32.mrb[11].mxu0  ;;  %v1207_v1 = vsel %vm4514_vm6, %v4511_v56, 0.0  ;;  %v1131_v13 = vpack.c.bf16 %v972_v8, %v972_v8 }
 0x339   : > { %v1208_v9 = vpack.c.bf16 %v1207_v1, %v1207_v1  ;;  %v3971_v1 = vld [vmem:[%s5050_s3 + $0x60] sm:$0xff]  }
 0x33b   : > { %v1273_v14 = vand.u32 %v4540_v10, %v1208_v9 }
 0x345   : > { %v1048_v53 = vpop.f32.mrb[8].mxu1 }
 0x346   : > { %v1049_v54 = vadd.f32 %v3246_v51, %v1048_v53  ;;  %v3667_v55 = vpop.f32.mrb[9].mxu1 }
 0x347   : > { %v1051_v58 = vpop.f32.mrb[10].mxu1 }
 0x348   : > { %v3668_v59 = vpop.f32.mrb[11].mxu1  ;;  %v1137_v60 = vsel %vm1133_vm5, %v1049_v54, 0.0  ;;  %v1205_v61 = vsel %vm4514_vm6, %v1049_v54, 0.0  ;;  %v1366_v7 = vsel %vm4530_vm10, %v1049_v54, 0.0  ;;  %v1477_v17 = vsel %vm4545_vm14, %v1049_v54, 0.0 }
 0x349   : > { %v1138_v62 = vpack.c.bf16 %v1137_v60, %v1137_v60  ;;  %v1206_v63 = vpack.c.bf16 %v1205_v61, %v1205_v61  ;;  %v1367_v12 = vpack.c.bf16 %v1366_v7, %v1366_v7  ;;  %v1478_v18 = vpack.c.bf16 %v1477_v17, %v1477_v17 }
 0x34a   : > { %v1139_v7 = vsel %vm1133_vm5, %v4511_v56, 0.0 }
 0x34b   : > { %v1145_v3 = vsel %vm933_vm2, %v1138_v62, 0  ;;  %v1210_v4 = vsel %vm933_vm2, %v1206_v63, 0  ;;  %v1371_v16 = vsel %vm933_vm2, %v1367_v12, 0  ;;  %v1482_v20 = vsel %vm933_vm2, %v1478_v18, 0 }
 0x34c   : > { %3682 = vmatpush3.bf16.xpose.msra.mxu0 %v1145_v3  ;;  %3688 = vmatpush3.bf16.xpose.msra.mxu1 %v1210_v4  ;;  %v3972_v3 = vld [vmem:[%s5050_s3 + $0x68] sm:$0xff]   ;;  %v3973_v4 = vld [vmem:[%s5050_s3 + $0x70] sm:$0xff]   ;;  %v1140_v9 = vpack.c.bf16 %v1139_v7, %v1139_v7  ;;  %v1368_v18 = vsel %vm4530_vm10, %v4511_v56, 0.0 }
 0x34d   : > { %3693 = vmatprep.subr.bf16.mxu0 %v4165_v19  ;;  %3705 = vmatprep.subr.bf16.mxu1 %v4165_v19 }
 0x353   : > { %3684 = vmatmul.mubr.msk.bf16.vlgmr.msra.gmra.mrb[12].mxu0 %vm933_vm2, %v1131_v13  ;;  %3690 = vmatmul.mubr.msk.bf16.vlgmr.msra.gmra.mrb[12].mxu1 %vm933_vm2, %v1131_v13 }
 0x354   : > { %3694 = vmatpush3.bf16.msra.mxu0 %v1273_v14  ;;  %3706 = vmatpush3.bf16.xpose.msra.mxu1 %v1371_v16  ;;  %v1319_v14 = vand.u32 %v4540_v10, %v1140_v9  ;;  %v3288_v9 = vld [vmem:[%s5051_s4 + $0x6] ss:$0 sm:$0xff] }
 0x355   : > { %3707 = vmatprep.mubr.msk.bf16.mxu1 %vm4166_vm1, %v4165_v19  ;;  %3717 = vmatprep.subr.bf16.mxu1 %v4165_v19 }
 0x356   : > { %3695 = vmatprep.mubr.msk.bf16.mxu0 %vm4166_vm1, %v4165_v19  ;;  %3699 = vmatprep.subr.bf16.mxu0 %v4165_v19 }
 0x35b   : > { %3708 = vmatmul.mubr.msk.bf16.vlgmr.msra.gmra.mrb[16].mxu1 %vm933_vm2, %v1131_v13 }
 0x35c   : > { %3718 = vmatpush3.bf16.xpose.msra.mxu1 %v1482_v20  ;;  %3719 = vmatprep.mubr.msk.bf16.mxu1 %vm4166_vm1, %v4165_v19 }
 0x35d   : > { %3729 = vmatprep.subr.bf16.mxu1 %v4165_v19 }
 0x363   : > { %3720 = vmatmul.mubr.msk.bf16.vlgmr.msra.gmra.mrb[20].mxu1 %vm933_vm2, %v1131_v13 }
 0x364   : > { %3737 = vmatprep.mubr.msk.bf16.mxu1 %vm4166_vm1, %v4165_v19  ;;  %3730 = vmatpush3.bf16.msra.mxu1 %v3971_v1  ;;  %v3988_v1 = vld [vmem:[%s5054_s7] sm:$0xff]  }
 0x365   : > { %3731 = vmatprep.subr.bf16.mxu1 %v4165_v19 }
 0x368   : > { %3732 = vmatpush3.bf16.msra.mxu1 %v3972_v3  ;;  %v3989_v3 = vld [vmem:[%s5054_s7 + $0x48] sm:$0xff]  }
 0x369   : > { %3733 = vmatprep.subr.bf16.mxu1 %v4165_v19 }
 0x36c   : > { %3734 = vmatpush3.bf16.msra.mxu1 %v3973_v4  ;;  %v3990_v4 = vld [vmem:[%s5054_s7 + $0x8] sm:$0xff]  }
 0x36d   : > { %3735 = vmatprep.subr.bf16.mxu1 %v4165_v19 }
 0x426   : > { %v1181_v21 = vpop.f32.mrb[12].mxu0  ;;  %v1246_v22 = vpop.f32.mrb[12].mxu1 }
 0x427   : > { %v3685_v23 = vpop.f32.mrb[13].mxu0  ;;  %v3691_v24 = vpop.f32.mrb[13].mxu1  ;;  %v1252_v25 = vsel %vm1187_vm15, %v1246_v22, -inf  ;;  %v1188_v30 = vsel %vm1187_vm15, %v1181_v21, -inf }
 0x428   : > { %v1184_v26 = vpop.f32.mrb[14].mxu0  ;;  %1253 = vmax.xlane.f32.xlu1 %v1252_v25  ;;  %v1249_v27 = vpop.f32.mrb[14].mxu1 }
 0x429   : > { %v3686_v28 = vpop.f32.mrb[15].mxu0  ;;  %v3692_v29 = vpop.f32.mrb[15].mxu1  ;;  %v1479_v26 = vsel %vm4545_vm14, %v4511_v56, 0.0  ;;  %v3974_v56 = vld [vmem:[%s5050_s3 + $0x78] sm:$0xff]  }
 0x42a   : > { %v1480_v28 = vpack.c.bf16 %v1479_v26, %v1479_v26  ;;  %3736 = vmatpush3.bf16.msra.mxu1 %v3974_v56  ;;  %v3998_v26 = vld [vmem:[%s5054_s7 + $0x28] sm:$0xff]  }
 0x42c   : > { %1189 = vmax.xlane.f32.xlu1 %v1188_v30  ;;  %v1540_v30 = vand.u32 %v1480_v28, %v4540_v10  ;;  %v4000_v28 = vld [vmem:[%s5054_s7 + $0x30] sm:$0xff]  }
 0x42e   : > { %v1407_v31 = vpop.f32.mrb[16].mxu1 }
 0x42f   : > { %v3709_v32 = vpop.f32.mrb[17].mxu1  ;;  %v1413_v33 = vsel %vm1187_vm15, %v1407_v31, -inf }
 0x430   : > { %1414 = vmax.xlane.f32.xlu0 %v1413_v33  ;;  %v1410_v34 = vpop.f32.mrb[18].mxu1 }
 0x431   : > { %v3710_v35 = vpop.f32.mrb[19].mxu1 }
 0x436   : > { %v1518_v36 = vpop.f32.mrb[20].mxu1 }
 0x437   : > { %v3721_v37 = vpop.f32.mrb[21].mxu1  ;;  %v1524_v38 = vsel %vm1187_vm15, %v1518_v36, -inf }
 0x438   : > { %1525 = vmax.xlane.f32.xlu1 %v1524_v38  ;;  %v1521_v39 = vpop.f32.mrb[22].mxu1 }
 0x439   : > { %v3722_v40 = vpop.f32.mrb[23].mxu1  ;;  %v3282_v39 = vld [vmem:[%s5051_s4 + $0x5] ss:$0 sm:$0xff] }
 0x4b5   : > { %v1254_v41 = vpop.xlane.xlu1 %1253 }
 0x4b6   : > { %v1255_v42 = vsub.f32 %v1246_v22, %v1254_v41 }
 0x4b8   : > { %v1256_v43 = vmul.f32 1.442695, %v1255_v42 }
 0x4b9   : > { %v1190_v44 = vpop.xlane.xlu1 %1189 }
 0x4ba   : > { %4049 = vpow2.f32 %v1256_v43  ;;  %v1191_v45 = vsub.f32 %v1181_v21, %v1190_v44  ;;  %v1369_v21 = vpack.c.bf16 %v1368_v18, %v1368_v18  ;;  %v3991_v18 = vld [vmem:[%s5054_s7 + $0x50] sm:$0xff]  }
 0x4bc   : > { %v1192_v46 = vmul.f32 1.442695, %v1191_v45  ;;  %v1429_v23 = vand.u32 %v1369_v21, %v4540_v10  ;;  %v3993_v21 = vld [vmem:[%s5054_s7 + $0x58] sm:$0xff]  }
 0x4bd   : > { %v1415_v47 = vpop.xlane.xlu0 %1414 }
 0x4be   : > { %4051 = vpow2.f32 %v1192_v46  ;;  %v1416_v48 = vsub.f32 %v1407_v31, %v1415_v47 }
 0x4c0   : > { %v1417_v51 = vmul.f32 1.442695, %v1416_v48 }
 0x4c2   : > { %4053 = vpow2.f32 %v1417_v51 }
 0x4c4   : > { %v4050_v52 = vpop.eup %4049 }
 0x4c5   : > { %v1526_v53 = vpop.xlane.xlu1 %1525  ;;  %v1258_v54 = vsel %vm1187_vm15, %v4050_v52, 0.0 }
 0x4c6   : > { %v1527_v55 = vsub.f32 %v1518_v36, %v1526_v53  ;;  %1259 = vadd.xlane.f32.xlu0 %v1258_v54  ;;  %v3977_v54 = vld [vmem:[%s5052_s5 + $0x4] ss:$8 sps:$4 sm:$0xff]  }
 0x4c8   : > { %v4052_v58 = vpop.eup %4051  ;;  %v1528_v59 = vmul.f32 1.442695, %v1527_v55  ;;  %v3980_v55 = vld [vmem:[%s5052_s5 + $0x14] ss:$8 sps:$4 sm:$0xff]  }
 0x4c9   : > { %v1194_v60 = vsel %vm1187_vm15, %v4052_v58, 0.0 }
 0x4ca   : > { %4055 = vpow2.f32 %v1528_v59  ;;  %1195 = vadd.xlane.f32.xlu1 %v1194_v60  ;;  %v3983_v59 = vld [vmem:[%s5052_s5 + $0x24] ss:$8 sps:$4 sm:$0xff]   ;;  %v3981_v60 = vld [vmem:[%s5052_s5 + $0x20] ss:$8 sps:$4 sm:$0xff]  }
 0x4cc   : > { %v4054_v61 = vpop.eup %4053 }
 0x4cd   : > { %v1419_v62 = vsel %vm1187_vm15, %v4054_v61, 0.0 }
 0x4ce   : > { %1420 = vadd.xlane.f32.xlu0 %v1419_v62  ;;  %v3984_v62 = vld [vmem:[%s5052_s5 + $0x30] ss:$8 sps:$4 sm:$0xff]  }
 0x4d4   : > { %v4056_v63 = vpop.eup %4055 }
 0x4d5   : > { %v1530_v0 = vsel %vm1187_vm15, %v4056_v63, 0.0 }
 0x4d6   : > { %1531 = vadd.xlane.f32.xlu1 %v1530_v0  ;;  %v3987_v0 = vld [vmem:[%s5054_s7 + $0x40] sm:$0xff]  }
 0x4d7   : > { %3565 = vmatprep.subr.bf16.mxu1 %v3987_v0 }
 0x553   : > { %v1260_v5 = vpop.xlane.xlu0 %1259 }
 0x554   : > { %4057 = vrcp.f32 %v1260_v5 }
 0x557   : > { %v1196_v6 = vpop.xlane.xlu1 %1195 }
 0x558   : > { %4059 = vrcp.f32 %v1196_v6 }
 0x55b   : > { %v1421_v16 = vpop.xlane.xlu0 %1420 }
 0x55c   : > { %4061 = vrcp.f32 %v1421_v16 }
 0x55e   : > { %v4058_v8 = vpop.eup %4057 }
 0x55f   : > { %v1262_v12 = vmul.f32 %v4058_v8, %v4050_v52 }
 0x561   : > { %v1263_v13 = vpack.c.bf16 %v1262_v12, %v1262_v12 }
 0x562   : > { %v4060_v17 = vpop.eup %4059 }
 0x563   : > { %3696 = vmatmul.mubr.msk.bf16.vlgmr.msra.gmra.mrb[16].mxu0 %vm1264_vm3, %v1263_v13  ;;  %v1198_v20 = vmul.f32 %v4060_v17, %v4052_v58  ;;  %v1532_v24 = vpop.xlane.xlu1 %1531  ;;  %v3978_v58 = vld [vmem:[%s5052_s5 + $0x10] ss:$8 sps:$4 sm:$0xff]   ;;  %v3289_v13 = vld [vmem:[%s5051_s4 + $0x7] ss:$0 sm:$0xff] }
 0x564   : > { %3700 = vmatpush3.bf16.msra.mxu0 %v1319_v14  ;;  %3701 = vmatprep.mubr.msk.bf16.mxu0 %vm4166_vm1, %v4165_v19  ;;  %4063 = vrcp.f32 %v1532_v24  ;;  %v3996_v24 = vld [vmem:[%s5054_s7 + $0x20] sm:$0xff]  }
 0x565   : > { %3711 = vmatprep.subr.bf16.mxu0 %v4165_v19  ;;  %v1199_v22 = vpack.c.bf16 %v1198_v20, %v1198_v20  ;;  %v3992_v20 = vld [vmem:[%s5054_s7 + $0x10] sm:$0xff]  }
 0x566   : > { %v4062_v25 = vpop.eup %4061 }
 0x567   : > { %v1423_v27 = vmul.f32 %v4062_v25, %v4054_v61  ;;  %v3986_v61 = vld [vmem:[%s5052_s5 + $0x34] ss:$8 sps:$4 sm:$0xff]   ;;  %v3997_v25 = vld [vmem:[%s5054_s7 + $0x68] sm:$0xff]  }
 0x569   : > { %v1424_v29 = vpack.c.bf16 %v1423_v27, %v1423_v27  ;;  %v3999_v27 = vld [vmem:[%s5054_s7 + $0x70] sm:$0xff]  }
 0x56e   : > { %v4064_v31 = vpop.eup %4063 }
 0x56f   : > { %3702 = vmatmul.mubr.msk.bf16.vlgmr.msra.gmra.mrb[16].mxu0 %vm1264_vm3, %v1199_v22  ;;  %v1534_v32 = vmul.f32 %v4064_v31, %v4056_v63  ;;  %v4168_v63 = vmov 0   ;;  %v3994_v22 = vld [vmem:[%s5054_s7 + $0x18] sm:$0xff]   ;;  %v4711_v31 = vshrl.u32 %v860_v49, 7 }
 0x570   : > { %3712 = vmatpush3.bf16.msra.mxu0 %v1429_v23  ;;  %3713 = vmatprep.mubr.msk.bf16.mxu0 %vm4166_vm1, %v4165_v19  ;;  %v3995_v23 = vld [vmem:[%s5054_s7 + $0x60] sm:$0xff]  }
 0x571   : > { %3723 = vmatprep.subr.bf16.mxu0 %v4165_v19  ;;  %v1535_v33 = vpack.c.bf16 %v1534_v32, %v1534_v32  ;;  %v1701_v32 = vsub.s32 0, %v4711_v31  ;;  %v1705_v56 = vsub.s32 1, %v4711_v31 }
 0x57b   : > { %3714 = vmatmul.mubr.msk.bf16.vlgmr.msra.gmra.mrb[16].mxu0 %vm1264_vm3, %v1424_v29  ;;  %v4001_v29 = vld [vmem:[%s5054_s7 + $0x78] sm:$0xff]  }
 0x57c   : > { %3724 = vmatpush3.bf16.msra.mxu0 %v1540_v30  ;;  %3725 = vmatprep.mubr.msk.bf16.mxu0 %vm4166_vm1, %v4165_v19  ;;  %v4002_v30 = vld [vmem:[%s5054_s7 + $0x38] sm:$0xff]  }
 0x57d   : > { %1752 = vmatprep.subr.bf16.mxu0 %v3977_v54 }
 0x587   : > { %3726 = vmatmul.mubr.msk.bf16.vlgmr.msra.gmra.mrb[16].mxu0 %vm1264_vm3, %v1535_v33  ;;  %v1697_v33 = vld [vmem:[%s5053_s6] sm:$0x3] }
 0x588   : > { %1784 = vmatprep.mubr.bf16.mxu0 %v4168_v63 }
 0x65a   : > { %v1576_v34 = vpop.f32.mrb[16].mxu0 }
 0x65b   : > { %v1583_v35 = vpack.c.bf16 %v1576_v34, %v1576_v34  ;;  %v3727_v36 = vpop.f32.mrb[17].mxu0  ;;  %v1702_v34 = vrot.slane %v1697_v33, %v1701_v32 }
 0x65c   : > { %v1579_v37 = vpop.f32.mrb[18].mxu0 }
 0x65d   : > { %v3728_v38 = vpop.f32.mrb[19].mxu0  ;;  %3738 = vmatmul.mubr.msk.bf16.vlgmr.msra.gmra.mrb[24].mxu1 %vm933_vm2, %v1583_v35  ;;  %v1706_v35 = vrot.slane %v1697_v33, %v1705_v56  ;;  %v4012_v33 = vld [vmem:[%s5050_s3 + $0xa8] sm:$0xff]  }
 0x65e   : > { %3566 = vmatpush3.bf16.msra.mxu1 %v3988_v1 }
 0x65f   : > { %3567 = vmatprep.subr.bf16.mxu1 %v3989_v3 }
 0x662   : > { %3568 = vmatpush3.bf16.msra.mxu1 %v3990_v4 }
 0x663   : > { %3569 = vmatprep.subr.bf16.mxu1 %v3991_v18  ;;  %v4010_v18 = vld [vmem:[%s5050_s3 + $0xd8] sm:$0xff]  }
 0x666   : > { %3570 = vmatpush3.bf16.msra.mxu1 %v3992_v20 }
 0x667   : > { %3571 = vmatprep.subr.bf16.mxu1 %v3993_v21 }
 0x66a   : > { %3572 = vmatpush3.bf16.msra.mxu1 %v3994_v22 }
 0x66b   : > { %3573 = vmatprep.subr.bf16.mxu1 %v3995_v23 }
 0x66e   : > { %3574 = vmatpush3.bf16.msra.mxu1 %v3996_v24  ;;  %v3325_v24 = vld [vmem:[%s5051_s4 + $0x10] ss:$0 sm:$0xff] }
 0x66f   : > { %3575 = vmatprep.subr.bf16.mxu1 %v3997_v25 }
 0x672   : > { %3576 = vmatpush3.bf16.msra.mxu1 %v3998_v26  ;;  %v3326_v26 = vld [vmem:[%s5051_s4 + $0x11] ss:$0 sm:$0xff] }
 0x673   : > { %3577 = vmatprep.subr.bf16.mxu1 %v3999_v27 }
 0x676   : > { %3578 = vmatpush3.bf16.msra.mxu1 %v4000_v28 }
 0x677   : > { %3579 = vmatprep.subr.bf16.mxu1 %v4001_v29  ;;  %v4011_v29 = vld [vmem:[%s5050_s3 + $0xa0] sm:$0xff]  }
 0x67a   : > { %3580 = vmatpush3.bf16.msra.mxu1 %v4002_v30 }
 0x67b   : > { %3765 = vmatprep.subr.bf16.mxu1 %v4165_v19 }
 0x730   : > { %v1658_v40 = vpop.f32.mrb[24].mxu1 }
 0x731   : > { %v1659_v41 = vadd.f32 %v3282_v39, %v1658_v40  ;;  %v3739_v42 = vpop.f32.mrb[25].mxu1 }
 0x732   : > { %v1661_v43 = vpop.f32.mrb[26].mxu1 }
 0x733   : > { %v4620_v44 = vadd.f32 %v1659_v41, %v4425_v11  ;;  %v3740_v45 = vpop.f32.mrb[27].mxu1  ;;  %v3975_v11 = vld [vmem:[%s5052_s5] ss:$8 sps:$4 sm:$0xff]  }
 0x734   : > { %1753 = vmatpush1.bf16.msra.mxu0 %v3975_v11 }
 0x735   : > { %v1665_v46 = vsel %vm871_vm0, %v4620_v44, 0.0  ;;  %1754 = vmatprep.subr.bf16.mxu0 %v3980_v55 }
 0x736   : > { %1666 = vadd.xlane.f32.xlu0 %v1665_v46 }
 0x738   : > { %1755 = vmatpush1.bf16.msra.mxu0 %v3978_v58  ;;  %v3299_v58 = vld [vmem:[%s5051_s4 + $0x8] ss:$0 sm:$0xff] }
 0x739   : > { %1756 = vmatprep.subr.bf16.mxu0 %v3983_v59 }
 0x73c   : > { %1757 = vmatpush1.bf16.msra.mxu0 %v3981_v60 }
 0x73d   : > { %1758 = vmatprep.subr.bf16.mxu0 %v3986_v61 }
 0x740   : > { %1759 = vmatpush1.bf16.msra.mxu0 %v3984_v62 }
 0x741   : > { %3741 = vmatprep.subr.bf16.mxu0 %v4165_v19 }
 0x7c3   : > { %v1667_v47 = vpop.xlane.xlu0 %1666 }
 0x7c4   : > { %v1668_v48 = vmul.f32 0.015625, %v1667_v47 }
 0x7c6   : > { %v1669_v51 = vsub.f32 %v4620_v44, %v1668_v48 }
 0x7c8   : > { %v1670_v52 = vmul.f32 %v1669_v51, %v1669_v51 }
 0x7ca   : > { %v1671_v53 = vsel %vm871_vm0, %v1670_v52, 0.0 }
 0x7cb   : > { %1672 = vadd.xlane.f32.xlu1 %v1671_v53 }
 0x858   : > { %v1673_v5 = vpop.xlane.xlu1 %1672 }
 0x859   : > { %v1674_v6 = vmul.f32 0.015625, %v1673_v5 }
 0x85b   : > { %v1675_v7 = vadd.f32 1e-06, %v1674_v6 }
 0x85d   : > { %4065 = vrsqrt.f32 %v1675_v7 }
 0x867   : > { %v4066_v8 = vpop.eup %4065 }
 0x868   : > { %v1677_v12 = vmul.f32 %v4066_v8, %v1669_v51 }
 0x86a   : > { %v1682_v14 = vmul.f32 %v3288_v9, %v1677_v12  ;;  %v4003_v9 = vld [vmem:[%s5050_s3 + $0x80] sm:$0xff]   ;;  %v4005_v12 = vld [vmem:[%s5050_s3 + $0x88] sm:$0xff]  }
 0x86c   : > { %v1687_v16 = vadd.f32 %v3289_v13, %v1682_v14  ;;  %v4006_v13 = vld [vmem:[%s5050_s3 + $0xc8] sm:$0xff]   ;;  %v4007_v14 = vld [vmem:[%s5050_s3 + $0x90] sm:$0xff]  }
 0x86e   : > { %v1688_v17 = vpack.c.bf16 %v1687_v16, %v1687_v16  ;;  %v4008_v16 = vld [vmem:[%s5050_s3 + $0xd0] sm:$0xff]  }
 0x870   : > { %3298 = vmatmul.mubr.msk.bf16.vlgmr.msra.gmra.mrb[20].mxu0 %vm933_vm2, %v1688_v17  ;;  %v4009_v17 = vld [vmem:[%s5050_s3 + $0x98] sm:$0xff]  }
 0x871   : > { %3749 = vmatprep.mubr.msk.bf16.mxu0 %vm4166_vm1, %v4165_v19  ;;  %3742 = vmatpush3.bf16.msra.mxu0 %v4003_v9 }
 0x872   : > { %3743 = vmatprep.subr.bf16.mxu0 %v4165_v19 }
 0x875   : > { %3744 = vmatpush3.bf16.msra.mxu0 %v4005_v12 }
 0x876   : > { %3745 = vmatprep.subr.bf16.mxu0 %v4165_v19 }
 0x879   : > { %3746 = vmatpush3.bf16.msra.mxu0 %v4007_v14 }
 0x87a   : > { %3747 = vmatprep.subr.bf16.mxu0 %v4165_v19 }
 0x87d   : > { %3748 = vmatpush3.bf16.msra.mxu0 %v4009_v17 }
 0x87e   : > { %3753 = vmatprep.subr.bf16.mxu0 %v4165_v19 }
 0x943   : > { %v1786_v36 = vpop.f32.mrb[20].mxu0 }
 0x944   : > { %v1787_v37 = vadd.f32 %v1786_v36, %v1702_v34  ;;  %v1788_v38 = vpop.f32.mrb[21].mxu0  ;;  %v4013_v34 = vld [vmem:[%s5050_s3 + $0xb0] sm:$0xff]  }
 0x945   : > { %v1789_v39 = vadd.f32 %v1788_v38, %v1706_v35  ;;  %v1790_v49 = vpop.f32.mrb[22].mxu0  ;;  %v4014_v35 = vld [vmem:[%s5050_s3 + $0xb8] sm:$0xff]  }
 0x946   : > { %v1795_v40 = vmul.f32 0.70710677, %v1787_v37  ;;  %v1791_v41 = vpop.f32.mrb[23].mxu0  ;;  %v1793_v46 = vmul.f32 0.5, %v1787_v37 }
 0x947   : > { %v1796_v42 = vmul.f32 0.70710677, %v1789_v39  ;;  %v1794_v48 = vmul.f32 0.5, %v1789_v39 }
 0x948   : > { %4067 = verf.f32 %v1795_v40 }
 0x949   : > { %4069 = verf.f32 %v1796_v42 }
 0x952   : > { %v4068_v43 = vpop.eup %4067 }
 0x953   : > { %v4070_v45 = vpop.eup %4069  ;;  %v1799_v47 = vadd.f32 1.0, %v4068_v43  ;;  %v3349_v43 = vld [vmem:[%s5051_s4 + $0x13] ss:$0 sm:$0xff] }
 0x954   : > { %v1800_v51 = vadd.f32 1.0, %v4070_v45  ;;  %v3363_v45 = vld [vmem:[%s5051_s4 + $0x14] ss:$0 sm:$0xff] }
 0x955   : > { %v1801_v52 = vmul.f32 %v1799_v47, %v1793_v46 }
 0x956   : > { %v1802_v53 = vmul.f32 %v1800_v51, %v1794_v48 }
 0x957   : > { %v1803_v11 = vpack.c.bf16 %v1801_v52, %v1801_v52 }
 0x958   : > { %v1804_v54 = vpack.c.bf16 %v1802_v53, %v1802_v53 }
 0x95a   : > { %1969 = vmatprep.mubr.bf16.mxu1 %v1804_v54 }
 0x95b   : > { %1970 = vmatmul.mubr.bf16.vlgmr.msra.gmra.mrb[28].mxu1 %v1803_v11 }
 0x95c   : > { %3773 = vmatprep.mubr.msk.bf16.mxu1 %vm4166_vm1, %v4165_v19 }
 0xa2e   : > { %v3581_v55 = vpop.f32.mrb[28].mxu1 }
 0xa2f   : > { %v3582_v59 = vpop.f32.mrb[29].mxu1 }
 0xa30   : > { %v3583_v60 = vadd.f32 %v3582_v59, %v3581_v55  ;;  %v3584_v61 = vpop.f32.mrb[30].mxu1  ;;  %v3335_v59 = vld [vmem:[%s5051_s4 + $0x12] ss:$0 sm:$0xff] }
 0xa31   : > { %v3585_v62 = vpop.f32.mrb[31].mxu1 }
 0xa32   : > { %v1972_v0 = vadd.f32 %v3583_v60, %v3299_v58 }
 0xa34   : > { %v4728_v1 = vadd.f32 %v1972_v0, %v4620_v44  ;;  %v4004_v44 = vld [vmem:[%s5050_s3 + $0xc0] sm:$0xff]  }
 0xa35   : > { %3766 = vmatpush3.bf16.msra.mxu1 %v4004_v44 }
 0xa36   : > { %v1988_v3 = vsel %vm871_vm0, %v4728_v1, 0.0  ;;  %3767 = vmatprep.subr.bf16.mxu1 %v4165_v19 }
 0xa37   : > { %1989 = vadd.xlane.f32.xlu0 %v1988_v3 }
 0xa39   : > { %3768 = vmatpush3.bf16.msra.mxu1 %v4006_v13 }
 0xa3a   : > { %3769 = vmatprep.subr.bf16.mxu1 %v4165_v19 }
 0xa3d   : > { %3770 = vmatpush3.bf16.msra.mxu1 %v4008_v16 }
 0xa3e   : > { %3771 = vmatprep.subr.bf16.mxu1 %v4165_v19 }
 0xa41   : > { %3772 = vmatpush3.bf16.msra.mxu1 %v4010_v18 }
 0xa42   : > { %3783 = vmatprep.subr.bf16.mxu1 %v4165_v19 }
 0xac4   : > { %v1990_v4 = vpop.xlane.xlu0 %1989 }
 0xac5   : > { %v1991_v5 = vmul.f32 0.015625, %v1990_v4 }
 0xac7   : > { %v1992_v6 = vsub.f32 %v4728_v1, %v1991_v5 }
 0xac9   : > { %v1993_v7 = vmul.f32 %v1992_v6, %v1992_v6 }
 0xacb   : > { %v1994_v8 = vsel %vm871_vm0, %v1993_v7, 0.0 }
 0xacc   : > { %1995 = vadd.xlane.f32.xlu1 %v1994_v8 }
 0xb59   : > { %v1996_v20 = vpop.xlane.xlu1 %1995 }
 0xb5a   : > { %v1997_v21 = vmul.f32 0.015625, %v1996_v20 }
 0xb5c   : > { %v1998_v22 = vadd.f32 1e-06, %v1997_v21 }
 0xb5e   : > { %4071 = vrsqrt.f32 %v1998_v22 }
 0xb68   : > { %v4072_v23 = vpop.eup %4071 }
 0xb69   : > { %v2000_v25 = vmul.f32 %v4072_v23, %v1992_v6 }
 0xb6b   : > { %v2005_v27 = vmul.f32 %v3325_v24, %v2000_v25 }
 0xb6d   : > { %v2010_v28 = vadd.f32 %v3326_v26, %v2005_v27 }
 0xb6f   : > { %v2011_v30 = vpack.c.bf16 %v2010_v28, %v2010_v28 }
 0xb71   : > { %3750 = vmatmul.mubr.msk.bf16.vlgmr.msra.gmra.mrb[24].mxu0 %vm933_vm2, %v2011_v30  ;;  %3774 = vmatmul.mubr.msk.bf16.vlgmr.msra.gmra.mrb[32].mxu1 %vm933_vm2, %v2011_v30 }
 0xb72   : > { %3754 = vmatpush3.bf16.msra.mxu0 %v4011_v29  ;;  %3761 = vmatprep.mubr.msk.bf16.mxu0 %vm4166_vm1, %v4165_v19 }
 0xb73   : > { %3755 = vmatprep.subr.bf16.mxu0 %v4165_v19  ;;  %3785 = vmatprep.mubr.msk.bf16.mxu1 %vm4166_vm1, %v4165_v19 }
 0xb76   : > { %3756 = vmatpush3.bf16.msra.mxu0 %v4012_v33 }
 0xb77   : > { %3757 = vmatprep.subr.bf16.mxu0 %v4165_v19 }
 0xb7a   : > { %3758 = vmatpush3.bf16.msra.mxu0 %v4013_v34 }
 0xb7b   : > { %3759 = vmatprep.subr.bf16.mxu0 %v4165_v19 }
 0xb7e   : > { %3760 = vmatpush3.bf16.msra.mxu0 %v4014_v35 }
 0xb7f   : > { %3777 = vmatprep.subr.bf16.mxu0 %v4165_v19 }
 0xb81   : > { %3762 = vmatmul.mubr.msk.bf16.vlgmr.msra.gmra.mrb[28].mxu0 %vm933_vm2, %v2011_v30 }
 0xb82   : > { %3779 = vmatprep.mubr.msk.bf16.mxu0 %vm4166_vm1, %v4165_v19 }
 0xc44   : > { %v2086_v36 = vpop.f32.mrb[24].mxu0  ;;  %v2240_v37 = vpop.f32.mrb[32].mxu1 }
 0xc45   : > { %v3751_v38 = vpop.f32.mrb[25].mxu0  ;;  %v3775_v39 = vpop.f32.mrb[33].mxu1  ;;  %v4803_v51 = vadd.f32 %v3363_v45, %v2240_v37  ;;  %v2087_v3 = vadd.f32 %v3335_v59, %v2086_v36 }
 0xc46   : > { %v2089_v49 = vpop.f32.mrb[26].mxu0  ;;  %v2243_v40 = vpop.f32.mrb[34].mxu1 }
 0xc47   : > { %v3752_v41 = vpop.f32.mrb[27].mxu0  ;;  %v3776_v42 = vpop.f32.mrb[35].mxu1  ;;  %v2311_v60 = vsel %vm4514_vm6, %v4803_v51, 0.0  ;;  %v2246_v6 = vpack.c.bf16 %v2087_v3, %v2087_v3  ;;  %v2462_v50 = vsel %vm4530_vm10, %v4803_v51, 0.0  ;;  %v2568_v2 = vsel %vm4545_vm14, %v4803_v51, 0.0 }
 0xc48   : > { %v2312_v4 = vpack.c.bf16 %v2311_v60, %v2311_v60  ;;  %v4015_v60 = vld [vmem:[%s5050_s3 + $0xe0] sm:$0xff]  }
 0xc4a   : > { %v2372_v57 = vand.u32 %v2312_v4, %v4540_v10  ;;  %v2249_v4 = vsel %vm1133_vm5, %v4803_v51, 0.0 }
 0xc54   : > { %v2163_v46 = vpop.f32.mrb[28].mxu0 }
 0xc55   : > { %v2164_v47 = vadd.f32 %v3349_v43, %v2163_v46  ;;  %v3763_v48 = vpop.f32.mrb[29].mxu0 }
 0xc56   : > { %v2166_v52 = vpop.f32.mrb[30].mxu0 }
 0xc57   : > { %v3764_v53 = vpop.f32.mrb[31].mxu0  ;;  %v2247_v54 = vsel %vm1133_vm5, %v2164_v47, 0.0  ;;  %v2309_v11 = vsel %vm4514_vm6, %v2164_v47, 0.0  ;;  %v2460_v0 = vsel %vm4530_vm10, %v2164_v47, 0.0  ;;  %v2566_v8 = vsel %vm4545_vm14, %v2164_v47, 0.0 }
 0xc58   : > { %v2248_v55 = vpack.c.bf16 %v2247_v54, %v2247_v54  ;;  %v2310_v58 = vpack.c.bf16 %v2309_v11, %v2309_v11  ;;  %v2461_v5 = vpack.c.bf16 %v2460_v0, %v2460_v0  ;;  %v2567_v9 = vpack.c.bf16 %v2566_v8, %v2566_v8 }
 0xc5a   : > { %v2255_v61 = vsel %vm933_vm2, %v2248_v55, 0  ;;  %v2314_v62 = vsel %vm933_vm2, %v2310_v58, 0  ;;  %v2465_v7 = vsel %vm933_vm2, %v2461_v5, 0  ;;  %v2571_v44 = vsel %vm933_vm2, %v2567_v9, 0 }
 0xc5b   : > { %3778 = vmatpush3.bf16.xpose.msra.mxu0 %v2255_v61  ;;  %3784 = vmatpush3.bf16.xpose.msra.mxu1 %v2314_v62  ;;  %v4016_v61 = vld [vmem:[%s5050_s3 + $0xe8] sm:$0xff]   ;;  %v4017_v62 = vld [vmem:[%s5050_s3 + $0xf0] sm:$0xff]  }
 0xc5c   : > { %3789 = vmatprep.subr.bf16.mxu0 %v4165_v19  ;;  %3801 = vmatprep.subr.bf16.mxu1 %v4165_v19 }
 0xc62   : > { %3780 = vmatmul.mubr.msk.bf16.vlgmr.msra.gmra.mrb[32].mxu0 %vm933_vm2, %v2246_v6  ;;  %3786 = vmatmul.mubr.msk.bf16.vlgmr.msra.gmra.mrb[36].mxu1 %vm933_vm2, %v2246_v6 }
 0xc63   : > { %3790 = vmatpush3.bf16.msra.mxu0 %v2372_v57  ;;  %3802 = vmatpush3.bf16.xpose.msra.mxu1 %v2465_v7 }
 0xc64   : > { %3803 = vmatprep.mubr.msk.bf16.mxu1 %vm4166_vm1, %v4165_v19  ;;  %3813 = vmatprep.subr.bf16.mxu1 %v4165_v19 }
 0xc65   : > { %3791 = vmatprep.mubr.msk.bf16.mxu0 %vm4166_vm1, %v4165_v19  ;;  %3795 = vmatprep.subr.bf16.mxu0 %v4165_v19 }
 0xc6a   : > { %3804 = vmatmul.mubr.msk.bf16.vlgmr.msra.gmra.mrb[40].mxu1 %vm933_vm2, %v2246_v6 }
 0xc6b   : > { %3814 = vmatpush3.bf16.xpose.msra.mxu1 %v2571_v44  ;;  %3815 = vmatprep.mubr.msk.bf16.mxu1 %vm4166_vm1, %v4165_v19 }
 0xc6c   : > { %3825 = vmatprep.subr.bf16.mxu1 %v4165_v19 }
 0xc72   : > { %3816 = vmatmul.mubr.msk.bf16.vlgmr.msra.gmra.mrb[44].mxu1 %vm933_vm2, %v2246_v6  ;;  %v2250_v6 = vpack.c.bf16 %v2249_v4, %v2249_v4 }
 0xc73   : > { %3833 = vmatprep.mubr.msk.bf16.mxu1 %vm4166_vm1, %v4165_v19  ;;  %3826 = vmatpush3.bf16.msra.mxu1 %v4015_v60 }
 0xc74   : > { %3827 = vmatprep.subr.bf16.mxu1 %v4165_v19  ;;  %v2418_v8 = vand.u32 %v2250_v6, %v4540_v10 }
 0xc77   : > { %3828 = vmatpush3.bf16.msra.mxu1 %v4016_v61 }
 0xc78   : > { %3829 = vmatprep.subr.bf16.mxu1 %v4165_v19 }
 0xc7b   : > { %3830 = vmatpush3.bf16.msra.mxu1 %v4017_v62  ;;  %v3391_v62 = vld [vmem:[%s5051_s4 + $0x16] ss:$0 sm:$0xff] }
 0xc7c   : > { %3831 = vmatprep.subr.bf16.mxu1 %v4165_v19 }
 0xc7f   : > { %3832 = vmatpush3.bf16.msra.mxu1 %v4018_v15 }
 0xd35   : > { %v2291_v12 = vpop.f32.mrb[32].mxu0  ;;  %v2350_v13 = vpop.f32.mrb[36].mxu1 }
 0xd36   : > { %v3781_v14 = vpop.f32.mrb[33].mxu0  ;;  %v3787_v16 = vpop.f32.mrb[37].mxu1  ;;  %v2356_v17 = vsel %vm1187_vm15, %v2350_v13, -inf  ;;  %v2297_v18 = vsel %vm1187_vm15, %v2291_v12, -inf }
 0xd37   : > { %2357 = vmax.xlane.f32.xlu0 %v2356_v17  ;;  %v2353_v20 = vpop.f32.mrb[38].mxu1  ;;  %2298 = vmax.xlane.f32.xlu1 %v2297_v18  ;;  %v2294_v21 = vpop.f32.mrb[34].mxu0 }
 0xd38   : > { %v3782_v22 = vpop.f32.mrb[35].mxu0  ;;  %v3788_v23 = vpop.f32.mrb[39].mxu1  ;;  %v2569_v21 = vpack.c.bf16 %v2568_v2, %v2568_v2  ;;  %v3401_v2 = vld [vmem:[%s5053_s6 + $0x2] sm:$0x3] }
 0xd3a   : > { %v2629_v23 = vand.u32 %v2569_v21, %v4540_v10  ;;  %v2797_v21 = vrot.slane %v3401_v2, %v1705_v56 }
 0xd3d   : > { %v2501_v24 = vpop.f32.mrb[40].mxu1 }
 0xd3e   : > { %v3805_v25 = vpop.f32.mrb[41].mxu1  ;;  %v2507_v26 = vsel %vm1187_vm15, %v2501_v24, -inf }
 0xd3f   : > { %2508 = vmax.xlane.f32.xlu0 %v2507_v26  ;;  %v2504_v27 = vpop.f32.mrb[42].mxu1 }
 0xd40   : > { %v3806_v28 = vpop.f32.mrb[43].mxu1 }
 0xd45   : > { %v2607_v29 = vpop.f32.mrb[44].mxu1 }
 0xd46   : > { %v3817_v30 = vpop.f32.mrb[45].mxu1  ;;  %v2613_v33 = vsel %vm1187_vm15, %v2607_v29, -inf }
 0xd47   : > { %v2610_v34 = vpop.f32.mrb[46].mxu1  ;;  %2614 = vmax.xlane.f32.xlu1 %v2613_v33 }
 0xd48   : > { %v3818_v35 = vpop.f32.mrb[47].mxu1 }
 0xdc4   : > { %v2358_v36 = vpop.xlane.xlu0 %2357  ;;  %v2299_v37 = vpop.xlane.xlu1 %2298 }
 0xdc5   : > { %v2359_v38 = vsub.f32 %v2350_v13, %v2358_v36  ;;  %v2300_v39 = vsub.f32 %v2291_v12, %v2299_v37  ;;  %v2463_v13 = vpack.c.bf16 %v2462_v50, %v2462_v50  ;;  %v4040_v50 = vld [vmem:[%s5054_s7 + $0xa0] sm:$0xff]  }
 0xdc7   : > { %v2360_v49 = vmul.f32 1.442695, %v2359_v38  ;;  %v2301_v40 = vmul.f32 1.442695, %v2300_v39  ;;  %v2523_v16 = vand.u32 %v2463_v13, %v4540_v10  ;;  %v4042_v13 = vld [vmem:[%s5054_s7 + $0xa8] sm:$0xff]  }
 0xdc9   : > { %4073 = vpow2.f32 %v2360_v49 }
 0xdca   : > { %4075 = vpow2.f32 %v2301_v40 }
 0xdcc   : > { %v2509_v41 = vpop.xlane.xlu0 %2508 }
 0xdcd   : > { %v2510_v42 = vsub.f32 %v2501_v24, %v2509_v41 }
 0xdcf   : > { %v2511_v43 = vmul.f32 1.442695, %v2510_v42  ;;  %v4021_v42 = vld [vmem:[%s5052_s5 + $0x44] ss:$8 sps:$4 sm:$0xff]  }
 0xdd1   : > { %4077 = vpow2.f32 %v2511_v43  ;;  %v4024_v43 = vld [vmem:[%s5052_s5 + $0x54] ss:$8 sps:$4 sm:$0xff]  }
 0xdd3   : > { %v4074_v45 = vpop.eup %4073 }
 0xdd4   : > { %v4076_v46 = vpop.eup %4075  ;;  %v2615_v47 = vpop.xlane.xlu1 %2614  ;;  %v2362_v48 = vsel %vm1187_vm15, %v4074_v45, 0.0 }
 0xdd5   : > { %v2616_v52 = vsub.f32 %v2607_v29, %v2615_v47  ;;  %2363 = vadd.xlane.f32.xlu0 %v2362_v48  ;;  %v2303_v53 = vsel %vm1187_vm15, %v4076_v46, 0.0  ;;  %v4025_v47 = vld [vmem:[%s5052_s5 + $0x60] ss:$8 sps:$4 sm:$0xff]   ;;  %v4030_v48 = vld [vmem:[%s5052_s5 + $0x74] ss:$8 sps:$4 sm:$0xff]  }
 0xdd6   : > { %2304 = vadd.xlane.f32.xlu1 %v2303_v53  ;;  %v4031_v53 = vld [vmem:[%s5054_s7 + $0xc0] sm:$0xff]  }
 0xdd7   : > { %v2617_v54 = vmul.f32 1.442695, %v2616_v52  ;;  %v4028_v52 = vld [vmem:[%s5052_s5 + $0x70] ss:$8 sps:$4 sm:$0xff]   ;;  %3623 = vmatprep.subr.bf16.mxu1 %v4031_v53 }
 0xdd9   : > { %4079 = vpow2.f32 %v2617_v54  ;;  %v4032_v54 = vld [vmem:[%s5054_s7 + $0x80] sm:$0xff]  }
 0xddb   : > { %v4078_v11 = vpop.eup %4077 }
 0xddc   : > { %v2513_v55 = vsel %vm1187_vm15, %v4078_v11, 0.0 }
 0xddd   : > { %2514 = vadd.xlane.f32.xlu0 %v2513_v55  ;;  %v4034_v55 = vld [vmem:[%s5054_s7 + $0x88] sm:$0xff]  }
 0xde3   : > { %v4080_v58 = vpop.eup %4079 }
 0xde4   : > { %v2619_v59 = vsel %vm1187_vm15, %v4080_v58, 0.0 }
 0xde5   : > { %2620 = vadd.xlane.f32.xlu1 %v2619_v59 }
 0xe62   : > { %v2364_v0 = vpop.xlane.xlu0 %2363 }
 0xe63   : > { %4081 = vrcp.f32 %v2364_v0  ;;  %v2305_v3 = vpop.xlane.xlu1 %2304 }
 0xe64   : > { %4083 = vrcp.f32 %v2305_v3  ;;  %v3392_v3 = vld [vmem:[%s5051_s4 + $0x17] ss:$0 sm:$0xff] }
 0xe6a   : > { %v2515_v9 = vpop.xlane.xlu0 %2514 }
 0xe6b   : > { %4085 = vrcp.f32 %v2515_v9  ;;  %v4038_v9 = vld [vmem:[%s5054_s7 + $0x98] sm:$0xff]  }
 0xe6d   : > { %v4082_v5 = vpop.eup %4081 }
 0xe6e   : > { %v2366_v57 = vmul.f32 %v4082_v5, %v4074_v45  ;;  %v4084_v44 = vpop.eup %4083  ;;  %v4022_v45 = vld [vmem:[%s5052_s5 + $0x50] ss:$8 sps:$4 sm:$0xff]  }
 0xe6f   : > { %v2307_v12 = vmul.f32 %v4084_v44, %v4076_v46  ;;  %v4027_v46 = vld [vmem:[%s5052_s5 + $0x64] ss:$8 sps:$4 sm:$0xff]  }
 0xe70   : > { %v2367_v7 = vpack.c.bf16 %v2366_v57, %v2366_v57  ;;  %v4035_v57 = vld [vmem:[%s5054_s7 + $0xd0] sm:$0xff]   ;;  %v4039_v44 = vld [vmem:[%s5054_s7 + $0xe0] sm:$0xff]  }
 0xe71   : > { %v2308_v14 = vpack.c.bf16 %v2307_v12, %v2307_v12  ;;  %v4041_v12 = vld [vmem:[%s5054_s7 + $0xe8] sm:$0xff]  }
 0xe72   : > { %3792 = vmatmul.mubr.msk.bf16.vlgmr.msra.gmra.mrb[36].mxu0 %vm1264_vm3, %v2367_v7  ;;  %v2621_v17 = vpop.xlane.xlu1 %2620  ;;  %v4036_v7 = vld [vmem:[%s5054_s7 + $0x90] sm:$0xff]  }
 0xe73   : > { %3796 = vmatpush3.bf16.msra.mxu0 %v2418_v8  ;;  %3797 = vmatprep.mubr.msk.bf16.mxu0 %vm4166_vm1, %v4165_v19  ;;  %4087 = vrcp.f32 %v2621_v17  ;;  %v4037_v8 = vld [vmem:[%s5054_s7 + $0xd8] sm:$0xff]  }
 0xe74   : > { %3807 = vmatprep.subr.bf16.mxu0 %v4165_v19  ;;  %v4045_v17 = vld [vmem:[%s5054_s7 + $0xf8] sm:$0xff]  }
 0xe75   : > { %v4086_v18 = vpop.eup %4085 }
 0xe76   : > { %v2517_v20 = vmul.f32 %v4086_v18, %v4078_v11  ;;  %v4033_v11 = vld [vmem:[%s5054_s7 + $0xc8] sm:$0xff]   ;;  %v4046_v18 = vld [vmem:[%s5054_s7 + $0xb8] sm:$0xff]  }
 0xe78   : > { %v2518_v22 = vpack.c.bf16 %v2517_v20, %v2517_v20  ;;  %v2793_v20 = vrot.slane %v3401_v2, %v1701_v32 }
 0xe7d   : > { %v4088_v24 = vpop.eup %4087 }
 0xe7e   : > { %3798 = vmatmul.mubr.msk.bf16.vlgmr.msra.gmra.mrb[36].mxu0 %vm1264_vm3, %v2308_v14  ;;  %v2623_v25 = vmul.f32 %v4088_v24, %v4080_v58  ;;  %v4043_v14 = vld [vmem:[%s5054_s7 + $0xf0] sm:$0xff]  }
 0xe7f   : > { %3808 = vmatpush3.bf16.msra.mxu0 %v2523_v16  ;;  %3809 = vmatprep.mubr.msk.bf16.mxu0 %vm4166_vm1, %v4165_v19  ;;  %v4044_v16 = vld [vmem:[%s5054_s7 + $0xb0] sm:$0xff]  }
 0xe80   : > { %3819 = vmatprep.subr.bf16.mxu0 %v4165_v19  ;;  %v2624_v26 = vpack.c.bf16 %v2623_v25, %v2623_v25 }
 0xe8a   : > { %3810 = vmatmul.mubr.msk.bf16.vlgmr.msra.gmra.mrb[36].mxu0 %vm1264_vm3, %v2518_v22 }
 0xe8b   : > { %3820 = vmatpush3.bf16.msra.mxu0 %v2629_v23  ;;  %3821 = vmatprep.mubr.msk.bf16.mxu0 %vm4166_vm1, %v4165_v19  ;;  %v3385_v19 = vld [vmem:[%s5051_s4 + $0x15] ss:$0 sm:$0xff] }
 0xe8c   : > { %2843 = vmatprep.subr.bf16.mxu0 %v4021_v42 }
 0xe96   : > { %3822 = vmatmul.mubr.msk.bf16.vlgmr.msra.gmra.mrb[36].mxu0 %vm1264_vm3, %v2624_v26 }
 0xe97   : > { %2875 = vmatprep.mubr.bf16.mxu0 %v4168_v63 }
 0xf69   : > { %v2665_v51 = vpop.f32.mrb[36].mxu0 }
 0xf6a   : > { %v2672_v10 = vpack.c.bf16 %v2665_v51, %v2665_v51  ;;  %v3823_v27 = vpop.f32.mrb[37].mxu0 }
 0xf6b   : > { %v2668_v28 = vpop.f32.mrb[38].mxu0 }
 0xf6c   : > { %v3824_v29 = vpop.f32.mrb[39].mxu0  ;;  %3834 = vmatmul.mubr.msk.bf16.vlgmr.msra.gmra.mrb[48].mxu1 %vm933_vm2, %v2672_v10 }
 0xf6d   : > { %3624 = vmatpush3.bf16.msra.mxu1 %v4032_v54 }
 0xf6e   : > { %3625 = vmatprep.subr.bf16.mxu1 %v4033_v11  ;;  %v3070_v11 = vld [vmem:[%s5055_s8] sm:$0x1] }
 0xf71   : > { %3626 = vmatpush3.bf16.msra.mxu1 %v4034_v55  ;;  %v3071_v55 = vld [vmem:[%s5055_s8 + $0x1] sm:$0x1] }
 0xf72   : > { %3627 = vmatprep.subr.bf16.mxu1 %v4035_v57 }
 0xf75   : > { %3628 = vmatpush3.bf16.msra.mxu1 %v4036_v7 }
 0xf76   : > { %3629 = vmatprep.subr.bf16.mxu1 %v4037_v8 }
 0xf79   : > { %3630 = vmatpush3.bf16.msra.mxu1 %v4038_v9 }
 0xf7a   : > { %3631 = vmatprep.subr.bf16.mxu1 %v4039_v44 }
 0xf7d   : > { %3632 = vmatpush3.bf16.msra.mxu1 %v4040_v50 }
 0xf7e   : > { %3633 = vmatprep.subr.bf16.mxu1 %v4041_v12 }
 0xf81   : > { %3634 = vmatpush3.bf16.msra.mxu1 %v4042_v13 }
 0xf82   : > { %3635 = vmatprep.subr.bf16.mxu1 %v4043_v14 }
 0xf85   : > { %3636 = vmatpush3.bf16.msra.mxu1 %v4044_v16 }
 0xf86   : > { %3637 = vmatprep.subr.bf16.mxu1 %v4045_v17 }
 0xf89   : > { %3638 = vmatpush3.bf16.msra.mxu1 %v4046_v18 }
0x103f   : > { %v2747_v30 = vpop.f32.mrb[48].mxu1 }
0x1040   : > { %v2748_v33 = vadd.f32 %v3385_v19, %v2747_v30  ;;  %v3835_v34 = vpop.f32.mrb[49].mxu1 }
0x1041   : > { %v2750_v63 = vpop.f32.mrb[50].mxu1 }
0x1042   : > { %v4894_v35 = vadd.f32 %v2748_v33, %v4728_v1  ;;  %v3836_v36 = vpop.f32.mrb[51].mxu1  ;;  %v4019_v1 = vld [vmem:[%s5052_s5 + $0x40] ss:$8 sps:$4 sm:$0xff]  }
0x1043   : > { %2844 = vmatpush1.bf16.msra.mxu0 %v4019_v1  ;;  %v3443_v36 = vld [vmem:[%s5051_s4 + $0x18] ss:$0 sm:$0xff] }
0x1044   : > { %v2754_v37 = vsel %vm871_vm0, %v4894_v35, 0.0  ;;  %2845 = vmatprep.subr.bf16.mxu0 %v4024_v43 }
0x1045   : > { %2755 = vadd.xlane.f32.xlu0 %v2754_v37 }
0x1047   : > { %2846 = vmatpush1.bf16.msra.mxu0 %v4022_v45 }
0x1048   : > { %2847 = vmatprep.subr.bf16.mxu0 %v4027_v46 }
0x104b   : > { %2848 = vmatpush1.bf16.msra.mxu0 %v4025_v47 }
0x104c   : > { %2849 = vmatprep.subr.bf16.mxu0 %v4030_v48 }
0x104f   : > { %2850 = vmatpush1.bf16.msra.mxu0 %v4028_v52 }
0x10d2   : > { %v2756_v38 = vpop.xlane.xlu0 %2755 }
0x10d3   : > { %v2757_v39 = vmul.f32 0.015625, %v2756_v38 }
0x10d5   : > { %v2758_v49 = vsub.f32 %v4894_v35, %v2757_v39 }
0x10d7   : > { %v2759_v40 = vmul.f32 %v2758_v49, %v2758_v49 }
0x10d9   : > { %v2760_v41 = vsel %vm871_vm0, %v2759_v40, 0.0  ;;  %vm3072_vm0 = vcmask 516096  }
0x10da   : > { %2761 = vadd.xlane.f32.xlu1 %v2760_v41 }
0x1167   : > { %v2762_v58 = vpop.xlane.xlu1 %2761 }
0x1168   : > { %v2763_v59 = vmul.f32 0.015625, %v2762_v58 }
0x116a   : > { %v2764_v60 = vadd.f32 1e-06, %v2763_v59 }
0x116c   : > { %4089 = vrsqrt.f32 %v2764_v60 }
0x1176   : > { %v4090_v61 = vpop.eup %4089 }
0x1177   : > { %v2766_v0 = vmul.f32 %v4090_v61, %v2758_v49 }
0x1179   : > { %v2771_v4 = vmul.f32 %v3391_v62, %v2766_v0 }
0x117b   : > { %v2776_v5 = vadd.f32 %v3392_v3, %v2771_v4 }
0x117d   : > { %v2777_v6 = vpack.c.bf16 %v2776_v5, %v2776_v5 }
0x117f   : > { %3410 = vmatmul.mubr.msk.bf16.vlgmr.msra.gmra.mrb[40].mxu0 %vm933_vm2, %v2777_v6 }
0x1252   : > { %v2877_v22 = vpop.f32.mrb[40].mxu0 }
0x1253   : > { %v2878_v23 = vadd.f32 %v2877_v22, %v2793_v20  ;;  %v2879_v24 = vpop.f32.mrb[41].mxu0 }
0x1254   : > { %v2880_v25 = vadd.f32 %v2879_v24, %v2797_v21  ;;  %v2881_v26 = vpop.f32.mrb[42].mxu0 }
0x1255   : > { %v2886_v15 = vmul.f32 0.70710677, %v2878_v23  ;;  %v2882_v51 = vpop.f32.mrb[43].mxu0  ;;  %v2884_v29 = vmul.f32 0.5, %v2878_v23 }
0x1256   : > { %v2887_v10 = vmul.f32 0.70710677, %v2880_v25  ;;  %v2885_v30 = vmul.f32 0.5, %v2880_v25 }
0x1257   : > { %4091 = verf.f32 %v2886_v15 }
0x1258   : > { %4093 = verf.f32 %v2887_v10 }
0x1261   : > { %v4092_v27 = vpop.eup %4091 }
0x1262   : > { %v4094_v28 = vpop.eup %4093  ;;  %v2890_v19 = vadd.f32 1.0, %v4092_v27 }
0x1263   : > { %v2891_v33 = vadd.f32 1.0, %v4094_v28 }
0x1264   : > { %v2892_v32 = vmul.f32 %v2890_v19, %v2884_v29 }
0x1265   : > { %v2893_v34 = vmul.f32 %v2891_v33, %v2885_v30 }
0x1266   : > { %v2894_v56 = vpack.c.bf16 %v2892_v32, %v2892_v32 }
0x1267   : > { %v2895_v31 = vpack.c.bf16 %v2893_v34, %v2893_v34 }
0x1269   : > { %3061 = vmatprep.mubr.bf16.mxu1 %v2895_v31 }
0x126a   : > { %3062 = vmatmul.mubr.bf16.vlgmr.msra.gmra.mrb[52].mxu1 %v2894_v56 }
0x133d   : > { %v3639_v63 = vpop.f32.mrb[52].mxu1 }
0x133e   : > { %v3640_v37 = vpop.f32.mrb[53].mxu1 }
0x133f   : > { %v3641_v38 = vadd.f32 %v3640_v37, %v3639_v63  ;;  %v3642_v39 = vpop.f32.mrb[54].mxu1 }
0x1340   : > { %v3643_v49 = vpop.f32.mrb[55].mxu1 }
0x1341   : > { %v3064_v40 = vadd.f32 %v3641_v38, %v3443_v36 }
0x1343   : > { %v3069_v41 = vadd.f32 %v3064_v40, %v4894_v35 }
0x1345   : > { %v3073_v42 = vsel %vm3072_vm0, %v3069_v41, 0.0 }
0x1346   : > { %3074 = vadd.xlane.f32.xlu0 %v3073_v42 }
0x13d3   : > { %v3075_v1 = vpop.xlane.xlu0 %3074 }
0x13d4   : > { %v3076_v43 = vmul.f32 0.015625, %v3075_v1 }
0x13d6   : > { %v3077_v45 = vsub.f32 %v3069_v41, %v3076_v43 }
0x13d8   : > { %v3078_v46 = vmul.f32 %v3077_v45, %v3077_v45 }
0x13da   : > { %v3079_v47 = vsel %vm3072_vm0, %v3078_v46, 0.0 }
0x13db   : > { %3080 = vadd.xlane.f32.xlu1 %v3079_v47 }
0x1468   : > { %v3081_v48 = vpop.xlane.xlu1 %3080 }
0x1469   : > { %v3082_v52 = vmul.f32 0.015625, %v3081_v48 }
0x146b   : > { %v3083_v53 = vadd.f32 1e-06, %v3082_v52 }
0x146d   : > { %4095 = vrsqrt.f32 %v3083_v53 }
0x1477   : > { %v4096_v54 = vpop.eup %4095 }
0x1478   : > { %v3085_v35 = vmul.f32 %v4096_v54, %v3077_v45 }
0x147a   : > { %v3086_v58 = vmul.f32 %v3085_v35, %v3070_v11 }
0x147c   : > { %v3087_v59 = vadd.f32 %v3086_v58, %v3071_v55 }
0x147e   : > { %v3088_v60 = vmul.f32 %v3087_v59, %v3087_v59 }
0x1480   : > { %v3089_v61 = vsel %vm3072_vm0, %v3088_v60, 0.0 }
0x1481   : > { %3090 = vadd.xlane.f32.xlu0 %v3089_v61 }
0x150e   : > { %v3091_v62 = vpop.xlane.xlu0 %3090 }
0x150f   : > { %4097 = vrsqrt.f32 %v3091_v62  ;;  %vm3094_vm1 = vcmp.eq.f32.partialorder %v3091_v62, inf  ;;  %v3097_v4 = vand.u32 2147483648, %v3091_v62  ;;  %vm3096_vm2 = vcmp.eq.f32.partialorder %v3091_v62, 0.0 }
0x1519   : > { %v4098_v0 = vpop.eup %4097 }
0x151a   : > { %v3093_v3 = vmul.f32 %v4098_v0, %v3091_v62 }
0x151c   : > { %v3095_v5 = vsel %vm3094_vm1, %v3091_v62, %v3093_v3 }
0x151d   : > { %v3098_v6 = vsel %vm3096_vm2, %v3097_v4, %v3095_v5 }
0x151e   : > { %v3099_v57 = vmax.f32 %v3098_v6, 1e-12 }
0x1520   : > { %4099 = vrcp.f32 %v3099_v57 }
0x152a   : > { %v4100_v7 = vpop.eup %4099 }
0x152b   : > { %v3101_v8 = vmul.f32 %v4100_v7, %v3087_v59 }
0x152d   : > { %3102 = vst.msk [vmem:[%s324_s21] sm:$0x1] %vm3072_vm0, %v3101_v8 }
0x152e   : > { %4114 = shalt.err (!%p4111_p3)
}
0x152f   : > { %s4115_s24 = scalar_lea.hbm %s5004_s26, 16  ;;  %s4119_s21 = scalar_lea.hbm %s5056_s9, 32 }
0x1530   : > { %p4116_p4 = scmp.ne.s32.totalorder %s5004_s26, %s4115_s24  ;;  %p4120_p9 = scmp.lt.u32.totalorder %s5004_s26, %s5056_s9 }
0x1531   : > { %p4121_p10 = scmp.lt.u32.totalorder %s4119_s21, %s4115_s24  ;;  %p4123_p12 = scmp.lt.u32.totalorder %s4115_s24, %s5004_s26 }
0x1532   : > { %p4117_p7 = pnand %p4116_p4, %p4258_p5 }
0x1533   : > { %p4122_p11 = por %p4121_p10, %p4120_p9 }
0x1534   : > { %p4118_p8 = pneg %p4117_p7 }
0x1535   : > { %p4124_p13 = por %p4123_p12, %p4122_p11 }
0x1537   : > { %p4125_p0 = pnand %p4124_p13, %p4118_p8 }
0x1539   : > { %4128 = shalt.err (!%p4125_p0)
}
0x153a   : > { %3862 = dma.vmem_to_hbm [thread:$0]  (%p4258_p5), %s5006_s27, 16, %s5004_s26, %s3104_s28  }
0x153b PF: > { %p3868_p1 = scmp.ge.s32.totalorder %s4163_s12, 2  ;;  %s3128_s23 = sand.u32 1, %s4151_s30  }
0x153c   : > { %s3129_s13 = scalar_lea.sflag [#allocation3], %s3128_s23 }
0x153d   : > { %p3865_p2 = pnand %p3868_p1, %p4262_p6 }
0x153f   : > { %4146 = dma.done.wait (!%p3865_p2), %s3129_s13, 16  }
0x1540   : > { %4148 = vsyncadd (!%p3865_p2), %s3129_s13, 4294967280  ;;  %p19_p3 = scmp.ge.s32.totalorder %s4245_s15, 4   ;;  %s5065_s30 = smov %s4155_s10 }
0x1541   : > { %s5066_s10 = smov %s4159_s11  ;;  %s5067_s11 = smov %s4256_s18 }
0x1542   : > { %s5068_s12 = smov %s4245_s15  ;;  %21 = sbr.rel (!%p19_p3) target bundleno = 3 (0x3), region = 102 }
0x1549   :  { %3133 = vsyncpa [#allocation3], 1 }
0x154a   :  { %3135 = vsyncpa [#allocation3 + $0x1], 1 }

</bundles_post_ra>
